<compile_context>
chip_gen: v6e
topology: v6e:2x2x1
jax: 0.10.0
libtpu: 0.0.40
codegen_flags: <defaults>
</compile_context>

<pallas_src>
import math
import functools

import jax
import jax.numpy as jnp
from jax.experimental import pallas as pl
from jax.experimental.pallas import tpu as pltpu


_NEG_INF = -1e30                      # large negative mask value (avoids inf-inf NaN)
_VMEM_LIMIT = 48 * 1024 * 1024        # fits v7x's 64 MiB physical VMEM with headroom
_SINGLE_BUFFER_WEIGHTS = True         # flipped to False by the fallback in __main__


def _const_spec(shape):
    """BlockSpec for an operand whose block index is constant across the grid.

    Requests a single pipeline buffer (no point double-buffering identical
    data); falls back to the default spec if this BlockSpec signature does not
    accept pipeline_mode.
    """
    index_map = lambda *_: (0,) * len(shape)
    if _SINGLE_BUFFER_WEIGHTS:
        try:
            return pl.BlockSpec(shape, index_map, pipeline_mode=pl.Buffered(1))
        except TypeError:
            pass
    return pl.BlockSpec(shape, index_map)


def _make_proj_kernel(n_heads: int, d_head: int):
    d_embed = n_heads * d_head
    scale = 1.0 / math.sqrt(d_head)

    def kernel(x_ref, w_in_ref, b_in_ref, q_ref, k_ref, v_ref):
        x = x_ref[0]                                           # (Ts, D) bf16
        qkv = jnp.dot(x, w_in_ref[...],
                      preferred_element_type=jnp.float32) + b_in_ref[...]
        # Split into heads ONCE here (head-major layout for the attention
        # kernel); the 1/sqrt(d_head) scale is folded into q.
        for h in range(n_heads):
            lo, hi = h * d_head, (h + 1) * d_head
            q_ref[0, h, :, :] = (qkv[:, lo:hi] * scale).astype(jnp.bfloat16)
            k_ref[0, h, :, :] = qkv[:, d_embed + lo:d_embed + hi].astype(jnp.bfloat16)
            v_ref[0, h, :, :] = qkv[:, 2 * d_embed + lo:2 * d_embed + hi].astype(jnp.bfloat16)

    return kernel


def _make_attn_kernel(n_heads: int, d_head: int, q_blk: int, k_blk: int,
                      causal: bool):
    d_embed = n_heads * d_head

    def kernel(q_ref, k_ref, v_ref, w_out_ref, b_out_ref, o_ref,
               m_ref, l_ref, acc_ref):
        i = pl.program_id(1)                  # query-tile index
        j = pl.program_id(2)                  # kv-tile index (innermost)
        n_kv = pl.num_programs(2)

        @pl.when(j == 0)
        def _init():
            m_ref[...] = jnp.full((n_heads, q_blk, 1), _NEG_INF, jnp.float32)
            l_ref[...] = jnp.zeros((n_heads, q_blk, 1), jnp.float32)
            acc_ref[...] = jnp.zeros((n_heads, q_blk, d_head), jnp.float32)

        def _update():
            q = q_ref[0]                      # (H, Tq, dh) bf16, pre-scaled
            k = k_ref[0]                      # (H, Tk, dh) bf16
            v = v_ref[0]                      # (H, Tk, dh) bf16
            # Batched over heads -> one dot_general, no per-head slicing.
            s = jnp.einsum("hqd,hkd->hqk", q, k,
                           preferred_element_type=jnp.float32)
            if causal:
                # Mask built once per tile (hoisted out of any per-head work).
                row = i * q_blk + jax.lax.broadcasted_iota(
                    jnp.int32, (q_blk, k_blk), 0)
                col = j * k_blk + jax.lax.broadcasted_iota(
                    jnp.int32, (q_blk, k_blk), 1)
                s = jnp.where((col > row)[None, :, :], _NEG_INF, s)

            m_prev = m_ref[...]                                   # (H, Tq, 1)
            m_new = jnp.maximum(m_prev, jnp.max(s, axis=-1, keepdims=True))
            alpha = jnp.exp(m_prev - m_new)
            p = jnp.exp(s - m_new)                                # f32 softmax math
            l_ref[...] = alpha * l_ref[...] + jnp.sum(p, axis=-1, keepdims=True)
            acc_ref[...] = alpha * acc_ref[...] + jnp.einsum(
                "hqk,hkd->hqd", p.astype(jnp.bfloat16), v,
                preferred_element_type=jnp.float32)
            m_ref[...] = m_new

        if causal:
            # Skip kv tiles entirely in the future of this q tile.
            pl.when(j * k_blk <= (i + 1) * q_blk - 1)(_update)
        else:
            _update()

        @pl.when(j == n_kv - 1)
        def _finalize():
            inv_l = pl.reciprocal(l_ref[...], approx=True)        # EUP, not VALU
            attn = acc_ref[...] * inv_l                           # (H, Tq, dh) f32
            # Fused out_proj: accumulate per-head contributions directly into a
            # lane-dense (Tq, D) tile (no concatenate / head relayout).
            acc_out = jnp.zeros((q_blk, d_embed), jnp.float32)
            for h in range(n_heads):
                lo, hi = h * d_head, (h + 1) * d_head
                acc_out = acc_out + jnp.dot(
                    attn[h].astype(jnp.bfloat16),
                    w_out_ref[lo:hi, :],
                    preferred_element_type=jnp.float32)
            o_ref[0] = (acc_out + b_out_ref[...]).astype(o_ref.dtype)

    return kernel


@functools.partial(jax.jit, static_argnames=("n_heads", "causal", "q_block",
                                             "k_block", "s_block"))
def self_attention_pallas(x, w_in, b_in, w_out, b_out, *, n_heads: int,
                          causal: bool = False, q_block: int = 256,
                          k_block: int = 256, s_block: int = 256):
    B, S, D = x.shape
    assert D % n_heads == 0
    d_head = D // n_heads

    s_blk = min(s_block, S)
    q_blk = min(q_block, S)
    k_blk = min(k_block, S)
    assert S % s_blk == 0 and S % q_blk == 0 and S % k_blk == 0, (
        "sequence length must be divisible by the chosen tile sizes")

    # bf16 MXU operands (f32 accumulation inside the kernels); weights are
    # pre-transposed ONCE here so the kernels never transpose on the hot path.
    x_c = x.astype(jnp.bfloat16)
    w_in_t = w_in.T.astype(jnp.bfloat16)              # (D, 3D)
    w_out_t = w_out.T.astype(jnp.bfloat16)            # (D, D)
    b_in_2d = b_in.reshape(1, 3 * D).astype(jnp.float32)
    b_out_2d = b_out.reshape(1, D).astype(jnp.float32)

    # ---- kernel 1: in_proj -> head-major scaled q, k, v -------------------
    head_shape = jax.ShapeDtypeStruct((B, n_heads, S, d_head), jnp.bfloat16)
    head_spec = pl.BlockSpec((1, n_heads, s_blk, d_head),
                             lambda b, s: (b, 0, s, 0))
    q_hm, k_hm, v_hm = pl.pallas_call(
        _make_proj_kernel(n_heads, d_head),
        out_shape=(head_shape, head_shape, head_shape),
        grid_spec=pltpu.PrefetchScalarGridSpec(
            num_scalar_prefetch=0,
            grid=(B, S // s_blk),
            in_specs=[
                pl.BlockSpec((1, s_blk, D), lambda b, s: (b, s, 0)),
                _const_spec((D, 3 * D)),
                _const_spec((1, 3 * D)),
            ],
            out_specs=(head_spec, head_spec, head_spec),
        ),
        compiler_params=pltpu.CompilerParams(
            dimension_semantics=("parallel", "parallel"),
            vmem_limit_bytes=_VMEM_LIMIT),
    )(x_c, w_in_t, b_in_2d)

    # ---- kernel 2: flash attention (online softmax) + fused out_proj ------
    out = pl.pallas_call(
        _make_attn_kernel(n_heads, d_head, q_blk, k_blk, causal),
        out_shape=jax.ShapeDtypeStruct((B, S, D), x.dtype),
        grid_spec=pltpu.PrefetchScalarGridSpec(
            num_scalar_prefetch=0,
            grid=(B, S // q_blk, S // k_blk),
            in_specs=[
                pl.BlockSpec((1, n_heads, q_blk, d_head),
                             lambda b, i, j: (b, 0, i, 0)),
                pl.BlockSpec((1, n_heads, k_blk, d_head),
                             lambda b, i, j: (b, 0, j, 0)),
                pl.BlockSpec((1, n_heads, k_blk, d_head),
                             lambda b, i, j: (b, 0, j, 0)),
                _const_spec((D, D)),
                _const_spec((1, D)),
            ],
            out_specs=pl.BlockSpec((1, q_blk, D), lambda b, i, j: (b, i, 0)),
            scratch_shapes=[
                pltpu.VMEM((n_heads, q_blk, 1), jnp.float32),        # running max
                pltpu.VMEM((n_heads, q_blk, 1), jnp.float32),        # running sum
                pltpu.VMEM((n_heads, q_blk, d_head), jnp.float32),   # running PV
            ],
        ),
        compiler_params=pltpu.CompilerParams(
            dimension_semantics=("parallel", "parallel", "arbitrary"),
            vmem_limit_bytes=_VMEM_LIMIT),
    )(q_hm, k_hm, v_hm, w_out_t, b_out_2d)
    return out


def self_attention_ref(x, w_in, b_in, w_out, b_out, n_heads, causal=False):
    """Pure-JAX (f32) reference matching the PyTorch forward pass."""
    B, S, D = x.shape
    d_head = D // n_heads
    qkv = x @ w_in.T + b_in
    q, k, v = jnp.split(qkv, 3, axis=-1)

    def heads(t):
        return t.reshape(B, S, n_heads, d_head).transpose(0, 2, 1, 3)

    q, k, v = heads(q), heads(k), heads(v)
    w = jnp.einsum("bhqd,bhkd->bhqk", q, k)
    if causal:
        row = jax.lax.broadcasted_iota(jnp.int32, (S, S), 0)
        col = jax.lax.broadcasted_iota(jnp.int32, (S, S), 1)
        w = jnp.where(col > row, -jnp.inf, w)
    w = w / math.sqrt(d_head)
    w = jax.nn.softmax(w, axis=-1)
    out = jnp.einsum("bhqk,bhkd->bhqd", w, v)
    out = out.transpose(0, 2, 1, 3).reshape(B, S, D)
    return out @ w_out.T + b_out


if __name__ == "__main__":
    B, S, D, H = 2, 8, 32, 4

    key = jax.random.PRNGKey(0)
    kx, kwi, kbi, kwo, kbo = jax.random.split(key, 5)

    x = jax.random.normal(kx, (B, S, D), dtype=jnp.float32)
    # nn.Linear(d_embed, 3*d_embed): weight (3D, D), bias (3D,)
    w_in = jax.random.normal(kwi, (3 * D, D), dtype=jnp.float32) * 0.05
    b_in = jax.random.normal(kbi, (3 * D,), dtype=jnp.float32) * 0.05
    # nn.Linear(d_embed, d_embed): weight (D, D), bias (D,)
    w_out = jax.random.normal(kwo, (D, D), dtype=jnp.float32) * 0.05
    b_out = jax.random.normal(kbo, (D,), dtype=jnp.float32) * 0.05

    def run(causal):
        return jax.block_until_ready(
            self_attention_pallas(x, w_in, b_in, w_out, b_out,
                                  n_heads=H, causal=causal))

    try:
        run(False)
    except Exception:
        # Fallback: if this jax/libtpu combination rejects single-buffered
        # (pl.Buffered(1)) weight blocks, retry with default double buffering.
        _SINGLE_BUFFER_WEIGHTS = False
        jax.clear_caches()

    for causal in (False, True):
        out = run(causal)
        ref = self_attention_ref(x, w_in, b_in, w_out, b_out,
                                 n_heads=H, causal=causal)
        assert out.shape == (B, S, D)
        err = jnp.max(jnp.abs(out - ref))
        # bf16 MXU operands + approx reciprocal -> compare against the f32
        # reference with a bf16-appropriate tolerance.
        assert jnp.allclose(out, ref, atol=2e-2, rtol=2e-2), (
            f"causal={causal}: max abs err {err}")

    print("KERNEL_OK")
</pallas_src>

<mosaic_0001>
module attributes {stable_mosaic.version = 11 : i64} {
  func.func @kernel(%arg0: i32, %arg1: i32, %arg2: memref<1x8x32xbf16, #tpu.memory_space<vmem>>, %arg3: memref<32x96xbf16, #tpu.memory_space<vmem>>, %arg4: memref<1x96xf32, #tpu.memory_space<vmem>>, %arg5: memref<1x4x8x8xbf16, #tpu.memory_space<vmem>>, %arg6: memref<1x4x8x8xbf16, #tpu.memory_space<vmem>>, %arg7: memref<1x4x8x8xbf16, #tpu.memory_space<vmem>>) attributes {dimension_semantics = [#tpu.dimension_semantics<parallel>, #tpu.dimension_semantics<parallel>], iteration_bounds = array<i64: 2, 1>, scalar_prefetch = 0 : i64, scratch_operands = 0 : i64, tpu.core_type = #tpu.core_type<tc>, window_params = [{transform_indices = @transform_0, window_bounds = array<i64: 1, 8, 32>}, {pipeline_mode = #tpu.pipeline_mode<synchronous>, transform_indices = @transform_1, window_bounds = array<i64: 32, 96>}, {pipeline_mode = #tpu.pipeline_mode<synchronous>, transform_indices = @transform_2, window_bounds = array<i64: 1, 96>}, {transform_indices = @transform_3, window_bounds = array<i64: 1, 4, 8, 8>}, {transform_indices = @transform_4, window_bounds = array<i64: 1, 4, 8, 8>}, {transform_indices = @transform_5, window_bounds = array<i64: 1, 4, 8, 8>}]} {
    %c0 = arith.constant 0 : index
    %c0_0 = arith.constant 0 : index
    %c0_1 = arith.constant 0 : index
    %0 = vector.load %arg2[%c0, %c0_0, %c0_1] : memref<1x8x32xbf16, #tpu.memory_space<vmem>>, vector<1x8x32xbf16>
    %1 = vector.shape_cast %0 : vector<1x8x32xbf16> to vector<8x32xbf16>
    %c0_2 = arith.constant 0 : index
    %c0_3 = arith.constant 0 : index
    %2 = vector.load %arg3[%c0_2, %c0_3] : memref<32x96xbf16, #tpu.memory_space<vmem>>, vector<32x96xbf16>
    %cst = arith.constant dense<0.000000e+00> : vector<8x96xf32>
    %3 = tpu.matmul %1, %2, %cst {dimension_numbers = #tpu.dot_dimension_numbers<[1], [0], [0], [1], [0, 0, 1, 1], [], []>} : vector<8x32xbf16>, vector<32x96xbf16>, vector<8x96xf32> -> vector<8x96xf32>
    %c0_4 = arith.constant 0 : index
    %c0_5 = arith.constant 0 : index
    %4 = vector.load %arg4[%c0_4, %c0_5] : memref<1x96xf32, #tpu.memory_space<vmem>>, vector<1x96xf32>
    %5 = vector.broadcast %4 : vector<1x96xf32> to vector<8x96xf32>
    %6 = arith.addf %3, %5 : vector<8x96xf32>
    %7 = vector.extract_strided_slice %6 {offsets = [0, 0], sizes = [8, 8], strides = [1, 1]} : vector<8x96xf32> to vector<8x8xf32>
    %cst_6 = arith.constant 0.353553385 : f32
    %8 = vector.broadcast %cst_6 : f32 to vector<8x8xf32>
    %9 = arith.mulf %7, %8 : vector<8x8xf32>
    %10 = arith.truncf %9 : vector<8x8xf32> to vector<8x8xbf16>
    %c0_7 = arith.constant 0 : index
    %c0_8 = arith.constant 0 : index
    %c0_9 = arith.constant 0 : index
    %c0_10 = arith.constant 0 : index
    %11 = vector.load %arg5[%c0_7, %c0_8, %c0_9, %c0_10] : memref<1x4x8x8xbf16, #tpu.memory_space<vmem>>, vector<1x1x8x8xbf16>
    %12 = vector.shape_cast %11 : vector<1x1x8x8xbf16> to vector<8x8xbf16>
    %13 = vector.shape_cast %10 : vector<8x8xbf16> to vector<1x1x8x8xbf16>
    tpu.vector_store %arg5[%c0_7, %c0_8, %c0_9, %c0_10], %13 {strides = array<i32>} : memref<1x4x8x8xbf16, #tpu.memory_space<vmem>>, vector<1x1x8x8xbf16>,
    %14 = vector.extract_strided_slice %6 {offsets = [0, 32], sizes = [8, 8], strides = [1, 1]} : vector<8x96xf32> to vector<8x8xf32>
    %15 = arith.truncf %14 : vector<8x8xf32> to vector<8x8xbf16>
    %c0_11 = arith.constant 0 : index
    %c0_12 = arith.constant 0 : index
    %c0_13 = arith.constant 0 : index
    %c0_14 = arith.constant 0 : index
    %16 = vector.load %arg6[%c0_11, %c0_12, %c0_13, %c0_14] : memref<1x4x8x8xbf16, #tpu.memory_space<vmem>>, vector<1x1x8x8xbf16>
    %17 = vector.shape_cast %16 : vector<1x1x8x8xbf16> to vector<8x8xbf16>
    %18 = vector.shape_cast %15 : vector<8x8xbf16> to vector<1x1x8x8xbf16>
    tpu.vector_store %arg6[%c0_11, %c0_12, %c0_13, %c0_14], %18 {strides = array<i32>} : memref<1x4x8x8xbf16, #tpu.memory_space<vmem>>, vector<1x1x8x8xbf16>,
    %19 = vector.extract_strided_slice %6 {offsets = [0, 64], sizes = [8, 8], strides = [1, 1]} : vector<8x96xf32> to vector<8x8xf32>
    %20 = arith.truncf %19 : vector<8x8xf32> to vector<8x8xbf16>
    %c0_15 = arith.constant 0 : index
    %c0_16 = arith.constant 0 : index
    %c0_17 = arith.constant 0 : index
    %c0_18 = arith.constant 0 : index
    %21 = vector.load %arg7[%c0_15, %c0_16, %c0_17, %c0_18] : memref<1x4x8x8xbf16, #tpu.memory_space<vmem>>, vector<1x1x8x8xbf16>
    %22 = vector.shape_cast %21 : vector<1x1x8x8xbf16> to vector<8x8xbf16>
    %23 = vector.shape_cast %20 : vector<8x8xbf16> to vector<1x1x8x8xbf16>
    tpu.vector_store %arg7[%c0_15, %c0_16, %c0_17, %c0_18], %23 {strides = array<i32>} : memref<1x4x8x8xbf16, #tpu.memory_space<vmem>>, vector<1x1x8x8xbf16>,
    %24 = vector.extract_strided_slice %6 {offsets = [0, 8], sizes = [8, 8], strides = [1, 1]} : vector<8x96xf32> to vector<8x8xf32>
    %cst_19 = arith.constant 0.353553385 : f32
    %25 = vector.broadcast %cst_19 : f32 to vector<8x8xf32>
    %26 = arith.mulf %24, %25 : vector<8x8xf32>
    %27 = arith.truncf %26 : vector<8x8xf32> to vector<8x8xbf16>
    %c0_20 = arith.constant 0 : index
    %c1 = arith.constant 1 : index
    %c0_21 = arith.constant 0 : index
    %c0_22 = arith.constant 0 : index
    %28 = vector.load %arg5[%c0_20, %c1, %c0_21, %c0_22] : memref<1x4x8x8xbf16, #tpu.memory_space<vmem>>, vector<1x1x8x8xbf16>
    %29 = vector.shape_cast %28 : vector<1x1x8x8xbf16> to vector<8x8xbf16>
    %30 = vector.shape_cast %27 : vector<8x8xbf16> to vector<1x1x8x8xbf16>
    tpu.vector_store %arg5[%c0_20, %c1, %c0_21, %c0_22], %30 {strides = array<i32>} : memref<1x4x8x8xbf16, #tpu.memory_space<vmem>>, vector<1x1x8x8xbf16>,
    %31 = vector.extract_strided_slice %6 {offsets = [0, 40], sizes = [8, 8], strides = [1, 1]} : vector<8x96xf32> to vector<8x8xf32>
    %32 = arith.truncf %31 : vector<8x8xf32> to vector<8x8xbf16>
    %c0_23 = arith.constant 0 : index
    %c1_24 = arith.constant 1 : index
    %c0_25 = arith.constant 0 : index
    %c0_26 = arith.constant 0 : index
    %33 = vector.load %arg6[%c0_23, %c1_24, %c0_25, %c0_26] : memref<1x4x8x8xbf16, #tpu.memory_space<vmem>>, vector<1x1x8x8xbf16>
    %34 = vector.shape_cast %33 : vector<1x1x8x8xbf16> to vector<8x8xbf16>
    %35 = vector.shape_cast %32 : vector<8x8xbf16> to vector<1x1x8x8xbf16>
    tpu.vector_store %arg6[%c0_23, %c1_24, %c0_25, %c0_26], %35 {strides = array<i32>} : memref<1x4x8x8xbf16, #tpu.memory_space<vmem>>, vector<1x1x8x8xbf16>,
    %36 = vector.extract_strided_slice %6 {offsets = [0, 72], sizes = [8, 8], strides = [1, 1]} : vector<8x96xf32> to vector<8x8xf32>
    %37 = arith.truncf %36 : vector<8x8xf32> to vector<8x8xbf16>
    %c0_27 = arith.constant 0 : index
    %c1_28 = arith.constant 1 : index
    %c0_29 = arith.constant 0 : index
    %c0_30 = arith.constant 0 : index
    %38 = vector.load %arg7[%c0_27, %c1_28, %c0_29, %c0_30] : memref<1x4x8x8xbf16, #tpu.memory_space<vmem>>, vector<1x1x8x8xbf16>
    %39 = vector.shape_cast %38 : vector<1x1x8x8xbf16> to vector<8x8xbf16>
    %40 = vector.shape_cast %37 : vector<8x8xbf16> to vector<1x1x8x8xbf16>
    tpu.vector_store %arg7[%c0_27, %c1_28, %c0_29, %c0_30], %40 {strides = array<i32>} : memref<1x4x8x8xbf16, #tpu.memory_space<vmem>>, vector<1x1x8x8xbf16>,
    %41 = vector.extract_strided_slice %6 {offsets = [0, 16], sizes = [8, 8], strides = [1, 1]} : vector<8x96xf32> to vector<8x8xf32>
    %cst_31 = arith.constant 0.353553385 : f32
    %42 = vector.broadcast %cst_31 : f32 to vector<8x8xf32>
    %43 = arith.mulf %41, %42 : vector<8x8xf32>
    %44 = arith.truncf %43 : vector<8x8xf32> to vector<8x8xbf16>
    %c0_32 = arith.constant 0 : index
    %c2 = arith.constant 2 : index
    %c0_33 = arith.constant 0 : index
    %c0_34 = arith.constant 0 : index
    %45 = vector.load %arg5[%c0_32, %c2, %c0_33, %c0_34] : memref<1x4x8x8xbf16, #tpu.memory_space<vmem>>, vector<1x1x8x8xbf16>
    %46 = vector.shape_cast %45 : vector<1x1x8x8xbf16> to vector<8x8xbf16>
    %47 = vector.shape_cast %44 : vector<8x8xbf16> to vector<1x1x8x8xbf16>
    tpu.vector_store %arg5[%c0_32, %c2, %c0_33, %c0_34], %47 {strides = array<i32>} : memref<1x4x8x8xbf16, #tpu.memory_space<vmem>>, vector<1x1x8x8xbf16>,
    %48 = vector.extract_strided_slice %6 {offsets = [0, 48], sizes = [8, 8], strides = [1, 1]} : vector<8x96xf32> to vector<8x8xf32>
    %49 = arith.truncf %48 : vector<8x8xf32> to vector<8x8xbf16>
    %c0_35 = arith.constant 0 : index
    %c2_36 = arith.constant 2 : index
    %c0_37 = arith.constant 0 : index
    %c0_38 = arith.constant 0 : index
    %50 = vector.load %arg6[%c0_35, %c2_36, %c0_37, %c0_38] : memref<1x4x8x8xbf16, #tpu.memory_space<vmem>>, vector<1x1x8x8xbf16>
    %51 = vector.shape_cast %50 : vector<1x1x8x8xbf16> to vector<8x8xbf16>
    %52 = vector.shape_cast %49 : vector<8x8xbf16> to vector<1x1x8x8xbf16>
    tpu.vector_store %arg6[%c0_35, %c2_36, %c0_37, %c0_38], %52 {strides = array<i32>} : memref<1x4x8x8xbf16, #tpu.memory_space<vmem>>, vector<1x1x8x8xbf16>,
    %53 = vector.extract_strided_slice %6 {offsets = [0, 80], sizes = [8, 8], strides = [1, 1]} : vector<8x96xf32> to vector<8x8xf32>
    %54 = arith.truncf %53 : vector<8x8xf32> to vector<8x8xbf16>
    %c0_39 = arith.constant 0 : index
    %c2_40 = arith.constant 2 : index
    %c0_41 = arith.constant 0 : index
    %c0_42 = arith.constant 0 : index
    %55 = vector.load %arg7[%c0_39, %c2_40, %c0_41, %c0_42] : memref<1x4x8x8xbf16, #tpu.memory_space<vmem>>, vector<1x1x8x8xbf16>
    %56 = vector.shape_cast %55 : vector<1x1x8x8xbf16> to vector<8x8xbf16>
    %57 = vector.shape_cast %54 : vector<8x8xbf16> to vector<1x1x8x8xbf16>
    tpu.vector_store %arg7[%c0_39, %c2_40, %c0_41, %c0_42], %57 {strides = array<i32>} : memref<1x4x8x8xbf16, #tpu.memory_space<vmem>>, vector<1x1x8x8xbf16>,
    %58 = vector.extract_strided_slice %6 {offsets = [0, 24], sizes = [8, 8], strides = [1, 1]} : vector<8x96xf32> to vector<8x8xf32>
    %cst_43 = arith.constant 0.353553385 : f32
    %59 = vector.broadcast %cst_43 : f32 to vector<8x8xf32>
    %60 = arith.mulf %58, %59 : vector<8x8xf32>
    %61 = arith.truncf %60 : vector<8x8xf32> to vector<8x8xbf16>
    %c0_44 = arith.constant 0 : index
    %c3 = arith.constant 3 : index
    %c0_45 = arith.constant 0 : index
    %c0_46 = arith.constant 0 : index
    %62 = vector.load %arg5[%c0_44, %c3, %c0_45, %c0_46] : memref<1x4x8x8xbf16, #tpu.memory_space<vmem>>, vector<1x1x8x8xbf16>
    %63 = vector.shape_cast %62 : vector<1x1x8x8xbf16> to vector<8x8xbf16>
    %64 = vector.shape_cast %61 : vector<8x8xbf16> to vector<1x1x8x8xbf16>
    tpu.vector_store %arg5[%c0_44, %c3, %c0_45, %c0_46], %64 {strides = array<i32>} : memref<1x4x8x8xbf16, #tpu.memory_space<vmem>>, vector<1x1x8x8xbf16>,
    %65 = vector.extract_strided_slice %6 {offsets = [0, 56], sizes = [8, 8], strides = [1, 1]} : vector<8x96xf32> to vector<8x8xf32>
    %66 = arith.truncf %65 : vector<8x8xf32> to vector<8x8xbf16>
    %c0_47 = arith.constant 0 : index
    %c3_48 = arith.constant 3 : index
    %c0_49 = arith.constant 0 : index
    %c0_50 = arith.constant 0 : index
    %67 = vector.load %arg6[%c0_47, %c3_48, %c0_49, %c0_50] : memref<1x4x8x8xbf16, #tpu.memory_space<vmem>>, vector<1x1x8x8xbf16>
    %68 = vector.shape_cast %67 : vector<1x1x8x8xbf16> to vector<8x8xbf16>
    %69 = vector.shape_cast %66 : vector<8x8xbf16> to vector<1x1x8x8xbf16>
    tpu.vector_store %arg6[%c0_47, %c3_48, %c0_49, %c0_50], %69 {strides = array<i32>} : memref<1x4x8x8xbf16, #tpu.memory_space<vmem>>, vector<1x1x8x8xbf16>,
    %70 = vector.extract_strided_slice %6 {offsets = [0, 88], sizes = [8, 8], strides = [1, 1]} : vector<8x96xf32> to vector<8x8xf32>
    %71 = arith.truncf %70 : vector<8x8xf32> to vector<8x8xbf16>
    %c0_51 = arith.constant 0 : index
    %c3_52 = arith.constant 3 : index
    %c0_53 = arith.constant 0 : index
    %c0_54 = arith.constant 0 : index
    %72 = vector.load %arg7[%c0_51, %c3_52, %c0_53, %c0_54] : memref<1x4x8x8xbf16, #tpu.memory_space<vmem>>, vector<1x1x8x8xbf16>
    %73 = vector.shape_cast %72 : vector<1x1x8x8xbf16> to vector<8x8xbf16>
    %74 = vector.shape_cast %71 : vector<8x8xbf16> to vector<1x1x8x8xbf16>
    tpu.vector_store %arg7[%c0_51, %c3_52, %c0_53, %c0_54], %74 {strides = array<i32>} : memref<1x4x8x8xbf16, #tpu.memory_space<vmem>>, vector<1x1x8x8xbf16>,
    return
  }
  func.func @transform_0(%arg0: i32, %arg1: i32) -> (i32, i32, i32) {
    %c0_i32 = arith.constant 0 : i32
    %c0_i32_0 = arith.constant 0 : i32
    return %arg0, %arg1, %c0_i32 : i32, i32, i32
  }
  func.func @transform_1(%arg0: i32, %arg1: i32) -> (i32, i32) {
    %c0_i32 = arith.constant 0 : i32
    %c0_i32_0 = arith.constant 0 : i32
    %c0_i32_1 = arith.constant 0 : i32
    return %c0_i32, %c0_i32_0 : i32, i32
  }
  func.func @transform_2(%arg0: i32, %arg1: i32) -> (i32, i32) {
    %c0_i32 = arith.constant 0 : i32
    %c0_i32_0 = arith.constant 0 : i32
    %c0_i32_1 = arith.constant 0 : i32
    return %c0_i32, %c0_i32_0 : i32, i32
  }
  func.func @transform_3(%arg0: i32, %arg1: i32) -> (i32, i32, i32, i32) {
    %c0_i32 = arith.constant 0 : i32
    %c0_i32_0 = arith.constant 0 : i32
    %c0_i32_1 = arith.constant 0 : i32
    return %arg0, %c0_i32, %arg1, %c0_i32_0 : i32, i32, i32, i32
  }
  func.func @transform_4(%arg0: i32, %arg1: i32) -> (i32, i32, i32, i32) {
    %c0_i32 = arith.constant 0 : i32
    %c0_i32_0 = arith.constant 0 : i32
    %c0_i32_1 = arith.constant 0 : i32
    return %arg0, %c0_i32, %arg1, %c0_i32_0 : i32, i32, i32, i32
  }
  func.func @transform_5(%arg0: i32, %arg1: i32) -> (i32, i32, i32, i32) {
    %c0_i32 = arith.constant 0 : i32
    %c0_i32_0 = arith.constant 0 : i32
    %c0_i32_1 = arith.constant 0 : i32
    return %arg0, %c0_i32, %arg1, %c0_i32_0 : i32, i32, i32, i32
  }
}

module attributes {stable_mosaic.version = 11 : i64} {
  func.func @kernel(%arg0: i32, %arg1: i32, %arg2: i32, %arg3: memref<1x4x8x8xbf16, #tpu.memory_space<vmem>>, %arg4: memref<1x4x8x8xbf16, #tpu.memory_space<vmem>>, %arg5: memref<1x4x8x8xbf16, #tpu.memory_space<vmem>>, %arg6: memref<32x32xbf16, #tpu.memory_space<vmem>>, %arg7: memref<1x32xf32, #tpu.memory_space<vmem>>, %arg8: memref<1x8x32xf32, #tpu.memory_space<vmem>>, %arg9: memref<4x8x1xf32, #tpu.memory_space<vmem>>, %arg10: memref<4x8x1xf32, #tpu.memory_space<vmem>>, %arg11: memref<4x8x8xf32, #tpu.memory_space<vmem>>) attributes {dimension_semantics = [#tpu.dimension_semantics<parallel>, #tpu.dimension_semantics<parallel>, #tpu.dimension_semantics<arbitrary>], iteration_bounds = array<i64: 2, 1, 1>, scalar_prefetch = 0 : i64, scratch_operands = 3 : i64, tpu.core_type = #tpu.core_type<tc>, window_params = [{transform_indices = @transform_0, window_bounds = array<i64: 1, 4, 8, 8>}, {transform_indices = @transform_1, window_bounds = array<i64: 1, 4, 8, 8>}, {transform_indices = @transform_2, window_bounds = array<i64: 1, 4, 8, 8>}, {pipeline_mode = #tpu.pipeline_mode<synchronous>, transform_indices = @transform_3, window_bounds = array<i64: 32, 32>}, {pipeline_mode = #tpu.pipeline_mode<synchronous>, transform_indices = @transform_4, window_bounds = array<i64: 1, 32>}, {transform_indices = @transform_5, window_bounds = array<i64: 1, 8, 32>}]} {
    %c0_i32 = arith.constant 0 : i32
    %0 = arith.cmpi eq, %arg2, %c0_i32 : i32
    %1 = arith.extui %0 : i1 to i32
    %c0_i32_0 = arith.constant 0 : i32
    %2 = arith.cmpi ne, %1, %c0_i32_0 : i32
    scf.if %2 {
      %cst_35 = arith.constant -1.000000e+30 : f32
      %36 = vector.broadcast %cst_35 : f32 to vector<4x8x1xf32>
      %c0_36 = arith.constant 0 : index
      %c0_37 = arith.constant 0 : index
      %c0_38 = arith.constant 0 : index
      %37 = vector.load %arg9[%c0_36, %c0_37, %c0_38] : memref<4x8x1xf32, #tpu.memory_space<vmem>>, vector<4x8x1xf32>
      tpu.vector_store %arg9[%c0_36, %c0_37, %c0_38], %36 {strides = array<i32>} : memref<4x8x1xf32, #tpu.memory_space<vmem>>, vector<4x8x1xf32>,
      %cst_39 = arith.constant 0.000000e+00 : f32
      %38 = vector.broadcast %cst_39 : f32 to vector<4x8x1xf32>
      %c0_40 = arith.constant 0 : index
      %c0_41 = arith.constant 0 : index
      %c0_42 = arith.constant 0 : index
      %39 = vector.load %arg10[%c0_40, %c0_41, %c0_42] : memref<4x8x1xf32, #tpu.memory_space<vmem>>, vector<4x8x1xf32>
      tpu.vector_store %arg10[%c0_40, %c0_41, %c0_42], %38 {strides = array<i32>} : memref<4x8x1xf32, #tpu.memory_space<vmem>>, vector<4x8x1xf32>,
      %cst_43 = arith.constant 0.000000e+00 : f32
      %40 = vector.broadcast %cst_43 : f32 to vector<4x8x8xf32>
      %c0_44 = arith.constant 0 : index
      %c0_45 = arith.constant 0 : index
      %c0_46 = arith.constant 0 : index
      %41 = vector.load %arg11[%c0_44, %c0_45, %c0_46] : memref<4x8x8xf32, #tpu.memory_space<vmem>>, vector<4x8x8xf32>
      tpu.vector_store %arg11[%c0_44, %c0_45, %c0_46], %40 {strides = array<i32>} : memref<4x8x8xf32, #tpu.memory_space<vmem>>, vector<4x8x8xf32>,
    } else {
    }
    %c0 = arith.constant 0 : index
    %c0_1 = arith.constant 0 : index
    %c0_2 = arith.constant 0 : index
    %c0_3 = arith.constant 0 : index
    %3 = vector.load %arg3[%c0, %c0_1, %c0_2, %c0_3] : memref<1x4x8x8xbf16, #tpu.memory_space<vmem>>, vector<1x4x8x8xbf16>
    %4 = vector.shape_cast %3 : vector<1x4x8x8xbf16> to vector<4x8x8xbf16>
    %c0_4 = arith.constant 0 : index
    %c0_5 = arith.constant 0 : index
    %c0_6 = arith.constant 0 : index
    %c0_7 = arith.constant 0 : index
    %5 = vector.load %arg4[%c0_4, %c0_5, %c0_6, %c0_7] : memref<1x4x8x8xbf16, #tpu.memory_space<vmem>>, vector<1x4x8x8xbf16>
    %6 = vector.shape_cast %5 : vector<1x4x8x8xbf16> to vector<4x8x8xbf16>
    %c0_8 = arith.constant 0 : index
    %c0_9 = arith.constant 0 : index
    %c0_10 = arith.constant 0 : index
    %c0_11 = arith.constant 0 : index
    %7 = vector.load %arg5[%c0_8, %c0_9, %c0_10, %c0_11] : memref<1x4x8x8xbf16, #tpu.memory_space<vmem>>, vector<1x4x8x8xbf16>
    %8 = vector.shape_cast %7 : vector<1x4x8x8xbf16> to vector<4x8x8xbf16>
    "tpu.trace_start"() <{level = 10 : i32, message = "hqd,hkd->hqk"}> : () -> ()
    %cst = arith.constant dense<0.000000e+00> : vector<4x8x8xf32>
    %9 = tpu.matmul %4, %6, %cst {dimension_numbers = #tpu.dot_dimension_numbers<[2], [2], [1], [1], [0, 0, 0, 1, 1, 1], [0], [0]>} : vector<4x8x8xbf16>, vector<4x8x8xbf16>, vector<4x8x8xf32> -> vector<4x8x8xf32>
    "tpu.trace_stop"() : () -> ()
    %c0_12 = arith.constant 0 : index
    %c0_13 = arith.constant 0 : index
    %c0_14 = arith.constant 0 : index
    %10 = vector.load %arg9[%c0_12, %c0_13, %c0_14] : memref<4x8x1xf32, #tpu.memory_space<vmem>>, vector<4x8x1xf32>
    %cst_15 = arith.constant dense<0xFF800000> : vector<4x8xf32>
    %11 = vector.multi_reduction <maximumf>, %9, %cst_15 [2] : vector<4x8x8xf32> to vector<4x8xf32>
    %12 = vector.shape_cast %11 : vector<4x8xf32> to vector<4x8x1xf32>
    %13 = arith.maximumf %10, %12 : vector<4x8x1xf32>
    %14 = arith.subf %10, %13 : vector<4x8x1xf32>
    %15 = math.exp %14 : vector<4x8x1xf32>
    %16 = vector.broadcast %13 : vector<4x8x1xf32> to vector<4x8x8xf32>
    %17 = arith.subf %9, %16 : vector<4x8x8xf32>
    %18 = math.exp %17 : vector<4x8x8xf32>
    %c0_16 = arith.constant 0 : index
    %c0_17 = arith.constant 0 : index
    %c0_18 = arith.constant 0 : index
    %19 = vector.load %arg10[%c0_16, %c0_17, %c0_18] : memref<4x8x1xf32, #tpu.memory_space<vmem>>, vector<4x8x1xf32>
    %20 = arith.mulf %15, %19 : vector<4x8x1xf32>
    %cst_19 = arith.constant dense<0.000000e+00> : vector<4x8xf32>
    %21 = vector.multi_reduction <add>, %18, %cst_19 [2] : vector<4x8x8xf32> to vector<4x8xf32>
    %22 = vector.shape_cast %21 : vector<4x8xf32> to vector<4x8x1xf32>
    %23 = arith.addf %20, %22 : vector<4x8x1xf32>
    %c0_20 = arith.constant 0 : index
    %c0_21 = arith.constant 0 : index
    %c0_22 = arith.constant 0 : index
    %24 = vector.load %arg10[%c0_20, %c0_21, %c0_22] : memref<4x8x1xf32, #tpu.memory_space<vmem>>, vector<4x8x1xf32>
    tpu.vector_store %arg10[%c0_20, %c0_21, %c0_22], %23 {strides = array<i32>} : memref<4x8x1xf32, #tpu.memory_space<vmem>>, vector<4x8x1xf32>,
    %c0_23 = arith.constant 0 : index
    %c0_24 = arith.constant 0 : index
    %c0_25 = arith.constant 0 : index
    %25 = vector.load %arg11[%c0_23, %c0_24, %c0_25] : memref<4x8x8xf32, #tpu.memory_space<vmem>>, vector<4x8x8xf32>
    %26 = vector.broadcast %15 : vector<4x8x1xf32> to vector<4x8x8xf32>
    %27 = arith.mulf %26, %25 : vector<4x8x8xf32>
    %28 = arith.truncf %18 : vector<4x8x8xf32> to vector<4x8x8xbf16>
    "tpu.trace_start"() <{level = 10 : i32, message = "hqk,hkd->hqd"}> : () -> ()
    %cst_26 = arith.constant dense<0.000000e+00> : vector<4x8x8xf32>
    %29 = tpu.matmul %28, %8, %cst_26 {dimension_numbers = #tpu.dot_dimension_numbers<[2], [1], [1], [2], [0, 0, 0, 1, 1, 2], [0], [0]>} : vector<4x8x8xbf16>, vector<4x8x8xbf16>, vector<4x8x8xf32> -> vector<4x8x8xf32>
    "tpu.trace_stop"() : () -> ()
    %30 = arith.addf %27, %29 : vector<4x8x8xf32>
    %c0_27 = arith.constant 0 : index
    %c0_28 = arith.constant 0 : index
    %c0_29 = arith.constant 0 : index
    %31 = vector.load %arg11[%c0_27, %c0_28, %c0_29] : memref<4x8x8xf32, #tpu.memory_space<vmem>>, vector<4x8x8xf32>
    tpu.vector_store %arg11[%c0_27, %c0_28, %c0_29], %30 {strides = array<i32>} : memref<4x8x8xf32, #tpu.memory_space<vmem>>, vector<4x8x8xf32>,
    %c0_30 = arith.constant 0 : index
    %c0_31 = arith.constant 0 : index
    %c0_32 = arith.constant 0 : index
    %32 = vector.load %arg9[%c0_30, %c0_31, %c0_32] : memref<4x8x1xf32, #tpu.memory_space<vmem>>, vector<4x8x1xf32>
    tpu.vector_store %arg9[%c0_30, %c0_31, %c0_32], %13 {strides = array<i32>} : memref<4x8x1xf32, #tpu.memory_space<vmem>>, vector<4x8x1xf32>,
    %c0_i32_33 = arith.constant 0 : i32
    %33 = arith.cmpi eq, %arg2, %c0_i32_33 : i32
    %34 = arith.extui %33 : i1 to i32
    %c0_i32_34 = arith.constant 0 : i32
    %35 = arith.cmpi ne, %34, %c0_i32_34 : i32
    scf.if %35 {
      %c0_35 = arith.constant 0 : index
      %c0_36 = arith.constant 0 : index
      %c0_37 = arith.constant 0 : index
      %36 = vector.load %arg10[%c0_35, %c0_36, %c0_37] : memref<4x8x1xf32, #tpu.memory_space<vmem>>, vector<4x8x1xf32>
      %37 = tpu.reciprocal %36 {approx = true} : vector<4x8x1xf32> -> vector<4x8x1xf32>
      %c0_38 = arith.constant 0 : index
      %c0_39 = arith.constant 0 : index
      %c0_40 = arith.constant 0 : index
      %38 = vector.load %arg11[%c0_38, %c0_39, %c0_40] : memref<4x8x8xf32, #tpu.memory_space<vmem>>, vector<4x8x8xf32>
      %39 = vector.broadcast %37 : vector<4x8x1xf32> to vector<4x8x8xf32>
      %40 = arith.mulf %38, %39 : vector<4x8x8xf32>
      %cst_41 = arith.constant 0.000000e+00 : f32
      %41 = vector.broadcast %cst_41 : f32 to vector<8x32xf32>
      %42 = vector.extract_strided_slice %40 {offsets = [0, 0, 0], sizes = [1, 8, 8], strides = [1, 1, 1]} : vector<4x8x8xf32> to vector<1x8x8xf32>
      %43 = vector.shape_cast %42 : vector<1x8x8xf32> to vector<8x8xf32>
      %44 = arith.truncf %43 : vector<8x8xf32> to vector<8x8xbf16>
      %c0_42 = arith.constant 0 : index
      %c0_43 = arith.constant 0 : index
      %45 = vector.load %arg6[%c0_42, %c0_43] : memref<32x32xbf16, #tpu.memory_space<vmem>>, vector<8x32xbf16>
      %cst_44 = arith.constant dense<0.000000e+00> : vector<8x32xf32>
      %46 = tpu.matmul %44, %45, %cst_44 {dimension_numbers = #tpu.dot_dimension_numbers<[1], [0], [0], [1], [0, 0, 1, 1], [], []>} : vector<8x8xbf16>, vector<8x32xbf16>, vector<8x32xf32> -> vector<8x32xf32>
      %47 = arith.addf %41, %46 : vector<8x32xf32>
      %48 = vector.extract_strided_slice %40 {offsets = [1, 0, 0], sizes = [1, 8, 8], strides = [1, 1, 1]} : vector<4x8x8xf32> to vector<1x8x8xf32>
      %49 = vector.shape_cast %48 : vector<1x8x8xf32> to vector<8x8xf32>
      %50 = arith.truncf %49 : vector<8x8xf32> to vector<8x8xbf16>
      %c8 = arith.constant 8 : index
      %c0_45 = arith.constant 0 : index
      %51 = vector.load %arg6[%c8, %c0_45] : memref<32x32xbf16, #tpu.memory_space<vmem>>, vector<8x32xbf16>
      %cst_46 = arith.constant dense<0.000000e+00> : vector<8x32xf32>
      %52 = tpu.matmul %50, %51, %cst_46 {dimension_numbers = #tpu.dot_dimension_numbers<[1], [0], [0], [1], [0, 0, 1, 1], [], []>} : vector<8x8xbf16>, vector<8x32xbf16>, vector<8x32xf32> -> vector<8x32xf32>
      %53 = arith.addf %47, %52 : vector<8x32xf32>
      %54 = vector.extract_strided_slice %40 {offsets = [2, 0, 0], sizes = [1, 8, 8], strides = [1, 1, 1]} : vector<4x8x8xf32> to vector<1x8x8xf32>
      %55 = vector.shape_cast %54 : vector<1x8x8xf32> to vector<8x8xf32>
      %56 = arith.truncf %55 : vector<8x8xf32> to vector<8x8xbf16>
      %c16 = arith.constant 16 : index
      %c0_47 = arith.constant 0 : index
      %57 = vector.load %arg6[%c16, %c0_47] : memref<32x32xbf16, #tpu.memory_space<vmem>>, vector<8x32xbf16>
      %cst_48 = arith.constant dense<0.000000e+00> : vector<8x32xf32>
      %58 = tpu.matmul %56, %57, %cst_48 {dimension_numbers = #tpu.dot_dimension_numbers<[1], [0], [0], [1], [0, 0, 1, 1], [], []>} : vector<8x8xbf16>, vector<8x32xbf16>, vector<8x32xf32> -> vector<8x32xf32>
      %59 = arith.addf %53, %58 : vector<8x32xf32>
      %60 = vector.extract_strided_slice %40 {offsets = [3, 0, 0], sizes = [1, 8, 8], strides = [1, 1, 1]} : vector<4x8x8xf32> to vector<1x8x8xf32>
      %61 = vector.shape_cast %60 : vector<1x8x8xf32> to vector<8x8xf32>
      %62 = arith.truncf %61 : vector<8x8xf32> to vector<8x8xbf16>
      %c24 = arith.constant 24 : index
      %c0_49 = arith.constant 0 : index
      %63 = vector.load %arg6[%c24, %c0_49] : memref<32x32xbf16, #tpu.memory_space<vmem>>, vector<8x32xbf16>
      %cst_50 = arith.constant dense<0.000000e+00> : vector<8x32xf32>
      %64 = tpu.matmul %62, %63, %cst_50 {dimension_numbers = #tpu.dot_dimension_numbers<[1], [0], [0], [1], [0, 0, 1, 1], [], []>} : vector<8x8xbf16>, vector<8x32xbf16>, vector<8x32xf32> -> vector<8x32xf32>
      %65 = arith.addf %59, %64 : vector<8x32xf32>
      %c0_51 = arith.constant 0 : index
      %c0_52 = arith.constant 0 : index
      %66 = vector.load %arg7[%c0_51, %c0_52] : memref<1x32xf32, #tpu.memory_space<vmem>>, vector<1x32xf32>
      %67 = vector.broadcast %66 : vector<1x32xf32> to vector<8x32xf32>
      %68 = arith.addf %65, %67 : vector<8x32xf32>
      %c0_53 = arith.constant 0 : index
      %c0_54 = arith.constant 0 : index
      %c0_55 = arith.constant 0 : index
      %69 = vector.load %arg8[%c0_53, %c0_54, %c0_55] : memref<1x8x32xf32, #tpu.memory_space<vmem>>, vector<1x8x32xf32>
      %70 = vector.shape_cast %69 : vector<1x8x32xf32> to vector<8x32xf32>
      %71 = vector.shape_cast %68 : vector<8x32xf32> to vector<1x8x32xf32>
      tpu.vector_store %arg8[%c0_53, %c0_54, %c0_55], %71 {strides = array<i32>} : memref<1x8x32xf32, #tpu.memory_space<vmem>>, vector<1x8x32xf32>,
    } else {
    }
    return
  }
  func.func @transform_0(%arg0: i32, %arg1: i32, %arg2: i32) -> (i32, i32, i32, i32) {
    %c0_i32 = arith.constant 0 : i32
    %c0_i32_0 = arith.constant 0 : i32
    %c0_i32_1 = arith.constant 0 : i32
    return %arg0, %c0_i32, %arg1, %c0_i32_0 : i32, i32, i32, i32
  }
  func.func @transform_1(%arg0: i32, %arg1: i32, %arg2: i32) -> (i32, i32, i32, i32) {
    %c0_i32 = arith.constant 0 : i32
    %c0_i32_0 = arith.constant 0 : i32
    %c0_i32_1 = arith.constant 0 : i32
    return %arg0, %c0_i32, %arg2, %c0_i32_0 : i32, i32, i32, i32
  }
  func.func @transform_2(%arg0: i32, %arg1: i32, %arg2: i32) -> (i32, i32, i32, i32) {
    %c0_i32 = arith.constant 0 : i32
    %c0_i32_0 = arith.constant 0 : i32
    %c0_i32_1 = arith.constant 0 : i32
    return %arg0, %c0_i32, %arg2, %c0_i32_0 : i32, i32, i32, i32
  }
  func.func @transform_3(%arg0: i32, %arg1: i32, %arg2: i32) -> (i32, i32) {
    %c0_i32 = arith.constant 0 : i32
    %c0_i32_0 = arith.constant 0 : i32
    %c0_i32_1 = arith.constant 0 : i32
    return %c0_i32, %c0_i32_0 : i32, i32
  }
  func.func @transform_4(%arg0: i32, %arg1: i32, %arg2: i32) -> (i32, i32) {
    %c0_i32 = arith.constant 0 : i32
    %c0_i32_0 = arith.constant 0 : i32
    %c0_i32_1 = arith.constant 0 : i32
    return %c0_i32, %c0_i32_0 : i32, i32
  }
  func.func @transform_5(%arg0: i32, %arg1: i32, %arg2: i32) -> (i32, i32, i32) {
    %c0_i32 = arith.constant 0 : i32
    %c0_i32_0 = arith.constant 0 : i32
    return %arg0, %arg1, %c0_i32 : i32, i32, i32
  }
}

module attributes {stable_mosaic.version = 11 : i64} {
  func.func @kernel(%arg0: i32, %arg1: i32, %arg2: i32, %arg3: memref<1x4x8x8xbf16, #tpu.memory_space<vmem>>, %arg4: memref<1x4x8x8xbf16, #tpu.memory_space<vmem>>, %arg5: memref<1x4x8x8xbf16, #tpu.memory_space<vmem>>, %arg6: memref<32x32xbf16, #tpu.memory_space<vmem>>, %arg7: memref<1x32xf32, #tpu.memory_space<vmem>>, %arg8: memref<1x8x32xf32, #tpu.memory_space<vmem>>, %arg9: memref<4x8x1xf32, #tpu.memory_space<vmem>>, %arg10: memref<4x8x1xf32, #tpu.memory_space<vmem>>, %arg11: memref<4x8x8xf32, #tpu.memory_space<vmem>>) attributes {dimension_semantics = [#tpu.dimension_semantics<parallel>, #tpu.dimension_semantics<parallel>, #tpu.dimension_semantics<arbitrary>], iteration_bounds = array<i64: 2, 1, 1>, scalar_prefetch = 0 : i64, scratch_operands = 3 : i64, tpu.core_type = #tpu.core_type<tc>, window_params = [{transform_indices = @transform_0, window_bounds = array<i64: 1, 4, 8, 8>}, {transform_indices = @transform_1, window_bounds = array<i64: 1, 4, 8, 8>}, {transform_indices = @transform_2, window_bounds = array<i64: 1, 4, 8, 8>}, {pipeline_mode = #tpu.pipeline_mode<synchronous>, transform_indices = @transform_3, window_bounds = array<i64: 32, 32>}, {pipeline_mode = #tpu.pipeline_mode<synchronous>, transform_indices = @transform_4, window_bounds = array<i64: 1, 32>}, {transform_indices = @transform_5, window_bounds = array<i64: 1, 8, 32>}]} {
    %c0_i32 = arith.constant 0 : i32
    %0 = arith.cmpi eq, %arg2, %c0_i32 : i32
    %1 = arith.extui %0 : i1 to i32
    %c0_i32_0 = arith.constant 0 : i32
    %2 = arith.cmpi ne, %1, %c0_i32_0 : i32
    scf.if %2 {
      %cst_35 = arith.constant -1.000000e+30 : f32
      %36 = vector.broadcast %cst_35 : f32 to vector<4x8x1xf32>
      %c0_36 = arith.constant 0 : index
      %c0_37 = arith.constant 0 : index
      %c0_38 = arith.constant 0 : index
      %37 = vector.load %arg9[%c0_36, %c0_37, %c0_38] : memref<4x8x1xf32, #tpu.memory_space<vmem>>, vector<4x8x1xf32>
      tpu.vector_store %arg9[%c0_36, %c0_37, %c0_38], %36 {strides = array<i32>} : memref<4x8x1xf32, #tpu.memory_space<vmem>>, vector<4x8x1xf32>,
      %cst_39 = arith.constant 0.000000e+00 : f32
      %38 = vector.broadcast %cst_39 : f32 to vector<4x8x1xf32>
      %c0_40 = arith.constant 0 : index
      %c0_41 = arith.constant 0 : index
      %c0_42 = arith.constant 0 : index
      %39 = vector.load %arg10[%c0_40, %c0_41, %c0_42] : memref<4x8x1xf32, #tpu.memory_space<vmem>>, vector<4x8x1xf32>
      tpu.vector_store %arg10[%c0_40, %c0_41, %c0_42], %38 {strides = array<i32>} : memref<4x8x1xf32, #tpu.memory_space<vmem>>, vector<4x8x1xf32>,
      %cst_43 = arith.constant 0.000000e+00 : f32
      %40 = vector.broadcast %cst_43 : f32 to vector<4x8x8xf32>
      %c0_44 = arith.constant 0 : index
      %c0_45 = arith.constant 0 : index
      %c0_46 = arith.constant 0 : index
      %41 = vector.load %arg11[%c0_44, %c0_45, %c0_46] : memref<4x8x8xf32, #tpu.memory_space<vmem>>, vector<4x8x8xf32>
      tpu.vector_store %arg11[%c0_44, %c0_45, %c0_46], %40 {strides = array<i32>} : memref<4x8x8xf32, #tpu.memory_space<vmem>>, vector<4x8x8xf32>,
    } else {
    }
    %c0 = arith.constant 0 : index
    %c0_1 = arith.constant 0 : index
    %c0_2 = arith.constant 0 : index
    %c0_3 = arith.constant 0 : index
    %3 = vector.load %arg3[%c0, %c0_1, %c0_2, %c0_3] : memref<1x4x8x8xbf16, #tpu.memory_space<vmem>>, vector<1x4x8x8xbf16>
    %4 = vector.shape_cast %3 : vector<1x4x8x8xbf16> to vector<4x8x8xbf16>
    %c0_4 = arith.constant 0 : index
    %c0_5 = arith.constant 0 : index
    %c0_6 = arith.constant 0 : index
    %c0_7 = arith.constant 0 : index
    %5 = vector.load %arg4[%c0_4, %c0_5, %c0_6, %c0_7] : memref<1x4x8x8xbf16, #tpu.memory_space<vmem>>, vector<1x4x8x8xbf16>
    %6 = vector.shape_cast %5 : vector<1x4x8x8xbf16> to vector<4x8x8xbf16>
    %c0_8 = arith.constant 0 : index
    %c0_9 = arith.constant 0 : index
    %c0_10 = arith.constant 0 : index
    %c0_11 = arith.constant 0 : index
    %7 = vector.load %arg5[%c0_8, %c0_9, %c0_10, %c0_11] : memref<1x4x8x8xbf16, #tpu.memory_space<vmem>>, vector<1x4x8x8xbf16>
    %8 = vector.shape_cast %7 : vector<1x4x8x8xbf16> to vector<4x8x8xbf16>
    "tpu.trace_start"() <{level = 10 : i32, message = "hqd,hkd->hqk"}> : () -> ()
    %cst = arith.constant dense<0.000000e+00> : vector<4x8x8xf32>
    %9 = tpu.matmul %4, %6, %cst {dimension_numbers = #tpu.dot_dimension_numbers<[2], [2], [1], [1], [0, 0, 0, 1, 1, 1], [0], [0]>} : vector<4x8x8xbf16>, vector<4x8x8xbf16>, vector<4x8x8xf32> -> vector<4x8x8xf32>
    "tpu.trace_stop"() : () -> ()
    %c0_12 = arith.constant 0 : index
    %c0_13 = arith.constant 0 : index
    %c0_14 = arith.constant 0 : index
    %10 = vector.load %arg9[%c0_12, %c0_13, %c0_14] : memref<4x8x1xf32, #tpu.memory_space<vmem>>, vector<4x8x1xf32>
    %cst_15 = arith.constant dense<0xFF800000> : vector<4x8xf32>
    %11 = vector.multi_reduction <maximumf>, %9, %cst_15 [2] : vector<4x8x8xf32> to vector<4x8xf32>
    %12 = vector.shape_cast %11 : vector<4x8xf32> to vector<4x8x1xf32>
    %13 = arith.maximumf %10, %12 : vector<4x8x1xf32>
    %14 = arith.subf %10, %13 : vector<4x8x1xf32>
    %15 = math.exp %14 : vector<4x8x1xf32>
    %16 = vector.broadcast %13 : vector<4x8x1xf32> to vector<4x8x8xf32>
    %17 = arith.subf %9, %16 : vector<4x8x8xf32>
    %18 = math.exp %17 : vector<4x8x8xf32>
    %c0_16 = arith.constant 0 : index
    %c0_17 = arith.constant 0 : index
    %c0_18 = arith.constant 0 : index
    %19 = vector.load %arg10[%c0_16, %c0_17, %c0_18] : memref<4x8x1xf32, #tpu.memory_space<vmem>>, vector<4x8x1xf32>
    %20 = arith.mulf %15, %19 : vector<4x8x1xf32>
    %cst_19 = arith.constant dense<0.000000e+00> : vector<4x8xf32>
    %21 = vector.multi_reduction <add>, %18, %cst_19 [2] : vector<4x8x8xf32> to vector<4x8xf32>
    %22 = vector.shape_cast %21 : vector<4x8xf32> to vector<4x8x1xf32>
    %23 = arith.addf %20, %22 : vector<4x8x1xf32>
    %c0_20 = arith.constant 0 : index
    %c0_21 = arith.constant 0 : index
    %c0_22 = arith.constant 0 : index
    %24 = vector.load %arg10[%c0_20, %c0_21, %c0_22] : memref<4x8x1xf32, #tpu.memory_space<vmem>>, vector<4x8x1xf32>
    tpu.vector_store %arg10[%c0_20, %c0_21, %c0_22], %23 {strides = array<i32>} : memref<4x8x1xf32, #tpu.memory_space<vmem>>, vector<4x8x1xf32>,
    %c0_23 = arith.constant 0 : index
    %c0_24 = arith.constant 0 : index
    %c0_25 = arith.constant 0 : index
    %25 = vector.load %arg11[%c0_23, %c0_24, %c0_25] : memref<4x8x8xf32, #tpu.memory_space<vmem>>, vector<4x8x8xf32>
    %26 = vector.broadcast %15 : vector<4x8x1xf32> to vector<4x8x8xf32>
    %27 = arith.mulf %26, %25 : vector<4x8x8xf32>
    %28 = arith.truncf %18 : vector<4x8x8xf32> to vector<4x8x8xbf16>
    "tpu.trace_start"() <{level = 10 : i32, message = "hqk,hkd->hqd"}> : () -> ()
    %cst_26 = arith.constant dense<0.000000e+00> : vector<4x8x8xf32>
    %29 = tpu.matmul %28, %8, %cst_26 {dimension_numbers = #tpu.dot_dimension_numbers<[2], [1], [1], [2], [0, 0, 0, 1, 1, 2], [0], [0]>} : vector<4x8x8xbf16>, vector<4x8x8xbf16>, vector<4x8x8xf32> -> vector<4x8x8xf32>
    "tpu.trace_stop"() : () -> ()
    %30 = arith.addf %27, %29 : vector<4x8x8xf32>
    %c0_27 = arith.constant 0 : index
    %c0_28 = arith.constant 0 : index
    %c0_29 = arith.constant 0 : index
    %31 = vector.load %arg11[%c0_27, %c0_28, %c0_29] : memref<4x8x8xf32, #tpu.memory_space<vmem>>, vector<4x8x8xf32>
    tpu.vector_store %arg11[%c0_27, %c0_28, %c0_29], %30 {strides = array<i32>} : memref<4x8x8xf32, #tpu.memory_space<vmem>>, vector<4x8x8xf32>,
    %c0_30 = arith.constant 0 : index
    %c0_31 = arith.constant 0 : index
    %c0_32 = arith.constant 0 : index
    %32 = vector.load %arg9[%c0_30, %c0_31, %c0_32] : memref<4x8x1xf32, #tpu.memory_space<vmem>>, vector<4x8x1xf32>
    tpu.vector_store %arg9[%c0_30, %c0_31, %c0_32], %13 {strides = array<i32>} : memref<4x8x1xf32, #tpu.memory_space<vmem>>, vector<4x8x1xf32>,
    %c0_i32_33 = arith.constant 0 : i32
    %33 = arith.cmpi eq, %arg2, %c0_i32_33 : i32
    %34 = arith.extui %33 : i1 to i32
    %c0_i32_34 = arith.constant 0 : i32
    %35 = arith.cmpi ne, %34, %c0_i32_34 : i32
    scf.if %35 {
      %c0_35 = arith.constant 0 : index
      %c0_36 = arith.constant 0 : index
      %c0_37 = arith.constant 0 : index
      %36 = vector.load %arg10[%c0_35, %c0_36, %c0_37] : memref<4x8x1xf32, #tpu.memory_space<vmem>>, vector<4x8x1xf32>
      %37 = tpu.reciprocal %36 {approx = true} : vector<4x8x1xf32> -> vector<4x8x1xf32>
      %c0_38 = arith.constant 0 : index
      %c0_39 = arith.constant 0 : index
      %c0_40 = arith.constant 0 : index
      %38 = vector.load %arg11[%c0_38, %c0_39, %c0_40] : memref<4x8x8xf32, #tpu.memory_space<vmem>>, vector<4x8x8xf32>
      %39 = vector.broadcast %37 : vector<4x8x1xf32> to vector<4x8x8xf32>
      %40 = arith.mulf %38, %39 : vector<4x8x8xf32>
      %cst_41 = arith.constant 0.000000e+00 : f32
      %41 = vector.broadcast %cst_41 : f32 to vector<8x32xf32>
      %42 = vector.extract_strided_slice %40 {offsets = [0, 0, 0], sizes = [1, 8, 8], strides = [1, 1, 1]} : vector<4x8x8xf32> to vector<1x8x8xf32>
      %43 = vector.shape_cast %42 : vector<1x8x8xf32> to vector<8x8xf32>
      %44 = arith.truncf %43 : vector<8x8xf32> to vector<8x8xbf16>
      %c0_42 = arith.constant 0 : index
      %c0_43 = arith.constant 0 : index
      %45 = vector.load %arg6[%c0_42, %c0_43] : memref<32x32xbf16, #tpu.memory_space<vmem>>, vector<8x32xbf16>
      %cst_44 = arith.constant dense<0.000000e+00> : vector<8x32xf32>
      %46 = tpu.matmul %44, %45, %cst_44 {dimension_numbers = #tpu.dot_dimension_numbers<[1], [0], [0], [1], [0, 0, 1, 1], [], []>} : vector<8x8xbf16>, vector<8x32xbf16>, vector<8x32xf32> -> vector<8x32xf32>
      %47 = arith.addf %41, %46 : vector<8x32xf32>
      %48 = vector.extract_strided_slice %40 {offsets = [1, 0, 0], sizes = [1, 8, 8], strides = [1, 1, 1]} : vector<4x8x8xf32> to vector<1x8x8xf32>
      %49 = vector.shape_cast %48 : vector<1x8x8xf32> to vector<8x8xf32>
      %50 = arith.truncf %49 : vector<8x8xf32> to vector<8x8xbf16>
      %c8 = arith.constant 8 : index
      %c0_45 = arith.constant 0 : index
      %51 = vector.load %arg6[%c8, %c0_45] : memref<32x32xbf16, #tpu.memory_space<vmem>>, vector<8x32xbf16>
      %cst_46 = arith.constant dense<0.000000e+00> : vector<8x32xf32>
      %52 = tpu.matmul %50, %51, %cst_46 {dimension_numbers = #tpu.dot_dimension_numbers<[1], [0], [0], [1], [0, 0, 1, 1], [], []>} : vector<8x8xbf16>, vector<8x32xbf16>, vector<8x32xf32> -> vector<8x32xf32>
      %53 = arith.addf %47, %52 : vector<8x32xf32>
      %54 = vector.extract_strided_slice %40 {offsets = [2, 0, 0], sizes = [1, 8, 8], strides = [1, 1, 1]} : vector<4x8x8xf32> to vector<1x8x8xf32>
      %55 = vector.shape_cast %54 : vector<1x8x8xf32> to vector<8x8xf32>
      %56 = arith.truncf %55 : vector<8x8xf32> to vector<8x8xbf16>
      %c16 = arith.constant 16 : index
      %c0_47 = arith.constant 0 : index
      %57 = vector.load %arg6[%c16, %c0_47] : memref<32x32xbf16, #tpu.memory_space<vmem>>, vector<8x32xbf16>
      %cst_48 = arith.constant dense<0.000000e+00> : vector<8x32xf32>
      %58 = tpu.matmul %56, %57, %cst_48 {dimension_numbers = #tpu.dot_dimension_numbers<[1], [0], [0], [1], [0, 0, 1, 1], [], []>} : vector<8x8xbf16>, vector<8x32xbf16>, vector<8x32xf32> -> vector<8x32xf32>
      %59 = arith.addf %53, %58 : vector<8x32xf32>
      %60 = vector.extract_strided_slice %40 {offsets = [3, 0, 0], sizes = [1, 8, 8], strides = [1, 1, 1]} : vector<4x8x8xf32> to vector<1x8x8xf32>
      %61 = vector.shape_cast %60 : vector<1x8x8xf32> to vector<8x8xf32>
      %62 = arith.truncf %61 : vector<8x8xf32> to vector<8x8xbf16>
      %c24 = arith.constant 24 : index
      %c0_49 = arith.constant 0 : index
      %63 = vector.load %arg6[%c24, %c0_49] : memref<32x32xbf16, #tpu.memory_space<vmem>>, vector<8x32xbf16>
      %cst_50 = arith.constant dense<0.000000e+00> : vector<8x32xf32>
      %64 = tpu.matmul %62, %63, %cst_50 {dimension_numbers = #tpu.dot_dimension_numbers<[1], [0], [0], [1], [0, 0, 1, 1], [], []>} : vector<8x8xbf16>, vector<8x32xbf16>, vector<8x32xf32> -> vector<8x32xf32>
      %65 = arith.addf %59, %64 : vector<8x32xf32>
      %c0_51 = arith.constant 0 : index
      %c0_52 = arith.constant 0 : index
      %66 = vector.load %arg7[%c0_51, %c0_52] : memref<1x32xf32, #tpu.memory_space<vmem>>, vector<1x32xf32>
      %67 = vector.broadcast %66 : vector<1x32xf32> to vector<8x32xf32>
      %68 = arith.addf %65, %67 : vector<8x32xf32>
      %c0_53 = arith.constant 0 : index
      %c0_54 = arith.constant 0 : index
      %c0_55 = arith.constant 0 : index
      %69 = vector.load %arg8[%c0_53, %c0_54, %c0_55] : memref<1x8x32xf32, #tpu.memory_space<vmem>>, vector<1x8x32xf32>
      %70 = vector.shape_cast %69 : vector<1x8x32xf32> to vector<8x32xf32>
      %71 = vector.shape_cast %68 : vector<8x32xf32> to vector<1x8x32xf32>
      tpu.vector_store %arg8[%c0_53, %c0_54, %c0_55], %71 {strides = array<i32>} : memref<1x8x32xf32, #tpu.memory_space<vmem>>, vector<1x8x32xf32>,
    } else {
    }
    return
  }
  func.func @transform_0(%arg0: i32, %arg1: i32, %arg2: i32) -> (i32, i32, i32, i32) {
    %c0_i32 = arith.constant 0 : i32
    %c0_i32_0 = arith.constant 0 : i32
    %c0_i32_1 = arith.constant 0 : i32
    return %arg0, %c0_i32, %arg1, %c0_i32_0 : i32, i32, i32, i32
  }
  func.func @transform_1(%arg0: i32, %arg1: i32, %arg2: i32) -> (i32, i32, i32, i32) {
    %c0_i32 = arith.constant 0 : i32
    %c0_i32_0 = arith.constant 0 : i32
    %c0_i32_1 = arith.constant 0 : i32
    return %arg0, %c0_i32, %arg2, %c0_i32_0 : i32, i32, i32, i32
  }
  func.func @transform_2(%arg0: i32, %arg1: i32, %arg2: i32) -> (i32, i32, i32, i32) {
    %c0_i32 = arith.constant 0 : i32
    %c0_i32_0 = arith.constant 0 : i32
    %c0_i32_1 = arith.constant 0 : i32
    return %arg0, %c0_i32, %arg2, %c0_i32_0 : i32, i32, i32, i32
  }
  func.func @transform_3(%arg0: i32, %arg1: i32, %arg2: i32) -> (i32, i32) {
    %c0_i32 = arith.constant 0 : i32
    %c0_i32_0 = arith.constant 0 : i32
    %c0_i32_1 = arith.constant 0 : i32
    return %c0_i32, %c0_i32_0 : i32, i32
  }
  func.func @transform_4(%arg0: i32, %arg1: i32, %arg2: i32) -> (i32, i32) {
    %c0_i32 = arith.constant 0 : i32
    %c0_i32_0 = arith.constant 0 : i32
    %c0_i32_1 = arith.constant 0 : i32
    return %c0_i32, %c0_i32_0 : i32, i32
  }
  func.func @transform_5(%arg0: i32, %arg1: i32, %arg2: i32) -> (i32, i32, i32) {
    %c0_i32 = arith.constant 0 : i32
    %c0_i32_0 = arith.constant 0 : i32
    return %arg0, %arg1, %c0_i32 : i32, i32, i32
  }
}

module attributes {stable_mosaic.version = 11 : i64} {
  func.func @kernel(%arg0: i32, %arg1: i32, %arg2: memref<1x8x32xbf16, #tpu.memory_space<vmem>>, %arg3: memref<32x96xbf16, #tpu.memory_space<vmem>>, %arg4: memref<1x96xf32, #tpu.memory_space<vmem>>, %arg5: memref<1x4x8x8xbf16, #tpu.memory_space<vmem>>, %arg6: memref<1x4x8x8xbf16, #tpu.memory_space<vmem>>, %arg7: memref<1x4x8x8xbf16, #tpu.memory_space<vmem>>) attributes {dimension_semantics = [#tpu.dimension_semantics<parallel>, #tpu.dimension_semantics<parallel>], iteration_bounds = array<i64: 2, 1>, scalar_prefetch = 0 : i64, scratch_operands = 0 : i64, tpu.core_type = #tpu.core_type<tc>, window_params = [{transform_indices = @transform_0, window_bounds = array<i64: 1, 8, 32>}, {pipeline_mode = #tpu.pipeline_mode<synchronous>, transform_indices = @transform_1, window_bounds = array<i64: 32, 96>}, {pipeline_mode = #tpu.pipeline_mode<synchronous>, transform_indices = @transform_2, window_bounds = array<i64: 1, 96>}, {transform_indices = @transform_3, window_bounds = array<i64: 1, 4, 8, 8>}, {transform_indices = @transform_4, window_bounds = array<i64: 1, 4, 8, 8>}, {transform_indices = @transform_5, window_bounds = array<i64: 1, 4, 8, 8>}]} {
    %c0 = arith.constant 0 : index
    %c0_0 = arith.constant 0 : index
    %c0_1 = arith.constant 0 : index
    %0 = vector.load %arg2[%c0, %c0_0, %c0_1] : memref<1x8x32xbf16, #tpu.memory_space<vmem>>, vector<1x8x32xbf16>
    %1 = vector.shape_cast %0 : vector<1x8x32xbf16> to vector<8x32xbf16>
    %c0_2 = arith.constant 0 : index
    %c0_3 = arith.constant 0 : index
    %2 = vector.load %arg3[%c0_2, %c0_3] : memref<32x96xbf16, #tpu.memory_space<vmem>>, vector<32x96xbf16>
    %cst = arith.constant dense<0.000000e+00> : vector<8x96xf32>
    %3 = tpu.matmul %1, %2, %cst {dimension_numbers = #tpu.dot_dimension_numbers<[1], [0], [0], [1], [0, 0, 1, 1], [], []>} : vector<8x32xbf16>, vector<32x96xbf16>, vector<8x96xf32> -> vector<8x96xf32>
    %c0_4 = arith.constant 0 : index
    %c0_5 = arith.constant 0 : index
    %4 = vector.load %arg4[%c0_4, %c0_5] : memref<1x96xf32, #tpu.memory_space<vmem>>, vector<1x96xf32>
    %5 = vector.broadcast %4 : vector<1x96xf32> to vector<8x96xf32>
    %6 = arith.addf %3, %5 : vector<8x96xf32>
    %7 = vector.extract_strided_slice %6 {offsets = [0, 0], sizes = [8, 8], strides = [1, 1]} : vector<8x96xf32> to vector<8x8xf32>
    %cst_6 = arith.constant 0.353553385 : f32
    %8 = vector.broadcast %cst_6 : f32 to vector<8x8xf32>
    %9 = arith.mulf %7, %8 : vector<8x8xf32>
    %10 = arith.truncf %9 : vector<8x8xf32> to vector<8x8xbf16>
    %c0_7 = arith.constant 0 : index
    %c0_8 = arith.constant 0 : index
    %c0_9 = arith.constant 0 : index
    %c0_10 = arith.constant 0 : index
    %11 = vector.load %arg5[%c0_7, %c0_8, %c0_9, %c0_10] : memref<1x4x8x8xbf16, #tpu.memory_space<vmem>>, vector<1x1x8x8xbf16>
    %12 = vector.shape_cast %11 : vector<1x1x8x8xbf16> to vector<8x8xbf16>
    %13 = vector.shape_cast %10 : vector<8x8xbf16> to vector<1x1x8x8xbf16>
    tpu.vector_store %arg5[%c0_7, %c0_8, %c0_9, %c0_10], %13 {strides = array<i32>} : memref<1x4x8x8xbf16, #tpu.memory_space<vmem>>, vector<1x1x8x8xbf16>,
    %14 = vector.extract_strided_slice %6 {offsets = [0, 32], sizes = [8, 8], strides = [1, 1]} : vector<8x96xf32> to vector<8x8xf32>
    %15 = arith.truncf %14 : vector<8x8xf32> to vector<8x8xbf16>
    %c0_11 = arith.constant 0 : index
    %c0_12 = arith.constant 0 : index
    %c0_13 = arith.constant 0 : index
    %c0_14 = arith.constant 0 : index
    %16 = vector.load %arg6[%c0_11, %c0_12, %c0_13, %c0_14] : memref<1x4x8x8xbf16, #tpu.memory_space<vmem>>, vector<1x1x8x8xbf16>
    %17 = vector.shape_cast %16 : vector<1x1x8x8xbf16> to vector<8x8xbf16>
    %18 = vector.shape_cast %15 : vector<8x8xbf16> to vector<1x1x8x8xbf16>
    tpu.vector_store %arg6[%c0_11, %c0_12, %c0_13, %c0_14], %18 {strides = array<i32>} : memref<1x4x8x8xbf16, #tpu.memory_space<vmem>>, vector<1x1x8x8xbf16>,
    %19 = vector.extract_strided_slice %6 {offsets = [0, 64], sizes = [8, 8], strides = [1, 1]} : vector<8x96xf32> to vector<8x8xf32>
    %20 = arith.truncf %19 : vector<8x8xf32> to vector<8x8xbf16>
    %c0_15 = arith.constant 0 : index
    %c0_16 = arith.constant 0 : index
    %c0_17 = arith.constant 0 : index
    %c0_18 = arith.constant 0 : index
    %21 = vector.load %arg7[%c0_15, %c0_16, %c0_17, %c0_18] : memref<1x4x8x8xbf16, #tpu.memory_space<vmem>>, vector<1x1x8x8xbf16>
    %22 = vector.shape_cast %21 : vector<1x1x8x8xbf16> to vector<8x8xbf16>
    %23 = vector.shape_cast %20 : vector<8x8xbf16> to vector<1x1x8x8xbf16>
    tpu.vector_store %arg7[%c0_15, %c0_16, %c0_17, %c0_18], %23 {strides = array<i32>} : memref<1x4x8x8xbf16, #tpu.memory_space<vmem>>, vector<1x1x8x8xbf16>,
    %24 = vector.extract_strided_slice %6 {offsets = [0, 8], sizes = [8, 8], strides = [1, 1]} : vector<8x96xf32> to vector<8x8xf32>
    %cst_19 = arith.constant 0.353553385 : f32
    %25 = vector.broadcast %cst_19 : f32 to vector<8x8xf32>
    %26 = arith.mulf %24, %25 : vector<8x8xf32>
    %27 = arith.truncf %26 : vector<8x8xf32> to vector<8x8xbf16>
    %c0_20 = arith.constant 0 : index
    %c1 = arith.constant 1 : index
    %c0_21 = arith.constant 0 : index
    %c0_22 = arith.constant 0 : index
    %28 = vector.load %arg5[%c0_20, %c1, %c0_21, %c0_22] : memref<1x4x8x8xbf16, #tpu.memory_space<vmem>>, vector<1x1x8x8xbf16>
    %29 = vector.shape_cast %28 : vector<1x1x8x8xbf16> to vector<8x8xbf16>
    %30 = vector.shape_cast %27 : vector<8x8xbf16> to vector<1x1x8x8xbf16>
    tpu.vector_store %arg5[%c0_20, %c1, %c0_21, %c0_22], %30 {strides = array<i32>} : memref<1x4x8x8xbf16, #tpu.memory_space<vmem>>, vector<1x1x8x8xbf16>,
    %31 = vector.extract_strided_slice %6 {offsets = [0, 40], sizes = [8, 8], strides = [1, 1]} : vector<8x96xf32> to vector<8x8xf32>
    %32 = arith.truncf %31 : vector<8x8xf32> to vector<8x8xbf16>
    %c0_23 = arith.constant 0 : index
    %c1_24 = arith.constant 1 : index
    %c0_25 = arith.constant 0 : index
    %c0_26 = arith.constant 0 : index
    %33 = vector.load %arg6[%c0_23, %c1_24, %c0_25, %c0_26] : memref<1x4x8x8xbf16, #tpu.memory_space<vmem>>, vector<1x1x8x8xbf16>
    %34 = vector.shape_cast %33 : vector<1x1x8x8xbf16> to vector<8x8xbf16>
    %35 = vector.shape_cast %32 : vector<8x8xbf16> to vector<1x1x8x8xbf16>
    tpu.vector_store %arg6[%c0_23, %c1_24, %c0_25, %c0_26], %35 {strides = array<i32>} : memref<1x4x8x8xbf16, #tpu.memory_space<vmem>>, vector<1x1x8x8xbf16>,
    %36 = vector.extract_strided_slice %6 {offsets = [0, 72], sizes = [8, 8], strides = [1, 1]} : vector<8x96xf32> to vector<8x8xf32>
    %37 = arith.truncf %36 : vector<8x8xf32> to vector<8x8xbf16>
    %c0_27 = arith.constant 0 : index
    %c1_28 = arith.constant 1 : index
    %c0_29 = arith.constant 0 : index
    %c0_30 = arith.constant 0 : index
    %38 = vector.load %arg7[%c0_27, %c1_28, %c0_29, %c0_30] : memref<1x4x8x8xbf16, #tpu.memory_space<vmem>>, vector<1x1x8x8xbf16>
    %39 = vector.shape_cast %38 : vector<1x1x8x8xbf16> to vector<8x8xbf16>
    %40 = vector.shape_cast %37 : vector<8x8xbf16> to vector<1x1x8x8xbf16>
    tpu.vector_store %arg7[%c0_27, %c1_28, %c0_29, %c0_30], %40 {strides = array<i32>} : memref<1x4x8x8xbf16, #tpu.memory_space<vmem>>, vector<1x1x8x8xbf16>,
    %41 = vector.extract_strided_slice %6 {offsets = [0, 16], sizes = [8, 8], strides = [1, 1]} : vector<8x96xf32> to vector<8x8xf32>
    %cst_31 = arith.constant 0.353553385 : f32
    %42 = vector.broadcast %cst_31 : f32 to vector<8x8xf32>
    %43 = arith.mulf %41, %42 : vector<8x8xf32>
    %44 = arith.truncf %43 : vector<8x8xf32> to vector<8x8xbf16>
    %c0_32 = arith.constant 0 : index
    %c2 = arith.constant 2 : index
    %c0_33 = arith.constant 0 : index
    %c0_34 = arith.constant 0 : index
    %45 = vector.load %arg5[%c0_32, %c2, %c0_33, %c0_34] : memref<1x4x8x8xbf16, #tpu.memory_space<vmem>>, vector<1x1x8x8xbf16>
    %46 = vector.shape_cast %45 : vector<1x1x8x8xbf16> to vector<8x8xbf16>
    %47 = vector.shape_cast %44 : vector<8x8xbf16> to vector<1x1x8x8xbf16>
    tpu.vector_store %arg5[%c0_32, %c2, %c0_33, %c0_34], %47 {strides = array<i32>} : memref<1x4x8x8xbf16, #tpu.memory_space<vmem>>, vector<1x1x8x8xbf16>,
    %48 = vector.extract_strided_slice %6 {offsets = [0, 48], sizes = [8, 8], strides = [1, 1]} : vector<8x96xf32> to vector<8x8xf32>
    %49 = arith.truncf %48 : vector<8x8xf32> to vector<8x8xbf16>
    %c0_35 = arith.constant 0 : index
    %c2_36 = arith.constant 2 : index
    %c0_37 = arith.constant 0 : index
    %c0_38 = arith.constant 0 : index
    %50 = vector.load %arg6[%c0_35, %c2_36, %c0_37, %c0_38] : memref<1x4x8x8xbf16, #tpu.memory_space<vmem>>, vector<1x1x8x8xbf16>
    %51 = vector.shape_cast %50 : vector<1x1x8x8xbf16> to vector<8x8xbf16>
    %52 = vector.shape_cast %49 : vector<8x8xbf16> to vector<1x1x8x8xbf16>
    tpu.vector_store %arg6[%c0_35, %c2_36, %c0_37, %c0_38], %52 {strides = array<i32>} : memref<1x4x8x8xbf16, #tpu.memory_space<vmem>>, vector<1x1x8x8xbf16>,
    %53 = vector.extract_strided_slice %6 {offsets = [0, 80], sizes = [8, 8], strides = [1, 1]} : vector<8x96xf32> to vector<8x8xf32>
    %54 = arith.truncf %53 : vector<8x8xf32> to vector<8x8xbf16>
    %c0_39 = arith.constant 0 : index
    %c2_40 = arith.constant 2 : index
    %c0_41 = arith.constant 0 : index
    %c0_42 = arith.constant 0 : index
    %55 = vector.load %arg7[%c0_39, %c2_40, %c0_41, %c0_42] : memref<1x4x8x8xbf16, #tpu.memory_space<vmem>>, vector<1x1x8x8xbf16>
    %56 = vector.shape_cast %55 : vector<1x1x8x8xbf16> to vector<8x8xbf16>
    %57 = vector.shape_cast %54 : vector<8x8xbf16> to vector<1x1x8x8xbf16>
    tpu.vector_store %arg7[%c0_39, %c2_40, %c0_41, %c0_42], %57 {strides = array<i32>} : memref<1x4x8x8xbf16, #tpu.memory_space<vmem>>, vector<1x1x8x8xbf16>,
    %58 = vector.extract_strided_slice %6 {offsets = [0, 24], sizes = [8, 8], strides = [1, 1]} : vector<8x96xf32> to vector<8x8xf32>
    %cst_43 = arith.constant 0.353553385 : f32
    %59 = vector.broadcast %cst_43 : f32 to vector<8x8xf32>
    %60 = arith.mulf %58, %59 : vector<8x8xf32>
    %61 = arith.truncf %60 : vector<8x8xf32> to vector<8x8xbf16>
    %c0_44 = arith.constant 0 : index
    %c3 = arith.constant 3 : index
    %c0_45 = arith.constant 0 : index
    %c0_46 = arith.constant 0 : index
    %62 = vector.load %arg5[%c0_44, %c3, %c0_45, %c0_46] : memref<1x4x8x8xbf16, #tpu.memory_space<vmem>>, vector<1x1x8x8xbf16>
    %63 = vector.shape_cast %62 : vector<1x1x8x8xbf16> to vector<8x8xbf16>
    %64 = vector.shape_cast %61 : vector<8x8xbf16> to vector<1x1x8x8xbf16>
    tpu.vector_store %arg5[%c0_44, %c3, %c0_45, %c0_46], %64 {strides = array<i32>} : memref<1x4x8x8xbf16, #tpu.memory_space<vmem>>, vector<1x1x8x8xbf16>,
    %65 = vector.extract_strided_slice %6 {offsets = [0, 56], sizes = [8, 8], strides = [1, 1]} : vector<8x96xf32> to vector<8x8xf32>
    %66 = arith.truncf %65 : vector<8x8xf32> to vector<8x8xbf16>
    %c0_47 = arith.constant 0 : index
    %c3_48 = arith.constant 3 : index
    %c0_49 = arith.constant 0 : index
    %c0_50 = arith.constant 0 : index
    %67 = vector.load %arg6[%c0_47, %c3_48, %c0_49, %c0_50] : memref<1x4x8x8xbf16, #tpu.memory_space<vmem>>, vector<1x1x8x8xbf16>
    %68 = vector.shape_cast %67 : vector<1x1x8x8xbf16> to vector<8x8xbf16>
    %69 = vector.shape_cast %66 : vector<8x8xbf16> to vector<1x1x8x8xbf16>
    tpu.vector_store %arg6[%c0_47, %c3_48, %c0_49, %c0_50], %69 {strides = array<i32>} : memref<1x4x8x8xbf16, #tpu.memory_space<vmem>>, vector<1x1x8x8xbf16>,
    %70 = vector.extract_strided_slice %6 {offsets = [0, 88], sizes = [8, 8], strides = [1, 1]} : vector<8x96xf32> to vector<8x8xf32>
    %71 = arith.truncf %70 : vector<8x8xf32> to vector<8x8xbf16>
    %c0_51 = arith.constant 0 : index
    %c3_52 = arith.constant 3 : index
    %c0_53 = arith.constant 0 : index
    %c0_54 = arith.constant 0 : index
    %72 = vector.load %arg7[%c0_51, %c3_52, %c0_53, %c0_54] : memref<1x4x8x8xbf16, #tpu.memory_space<vmem>>, vector<1x1x8x8xbf16>
    %73 = vector.shape_cast %72 : vector<1x1x8x8xbf16> to vector<8x8xbf16>
    %74 = vector.shape_cast %71 : vector<8x8xbf16> to vector<1x1x8x8xbf16>
    tpu.vector_store %arg7[%c0_51, %c3_52, %c0_53, %c0_54], %74 {strides = array<i32>} : memref<1x4x8x8xbf16, #tpu.memory_space<vmem>>, vector<1x1x8x8xbf16>,
    return
  }
  func.func @transform_0(%arg0: i32, %arg1: i32) -> (i32, i32, i32) {
    %c0_i32 = arith.constant 0 : i32
    %c0_i32_0 = arith.constant 0 : i32
    return %arg0, %arg1, %c0_i32 : i32, i32, i32
  }
  func.func @transform_1(%arg0: i32, %arg1: i32) -> (i32, i32) {
    %c0_i32 = arith.constant 0 : i32
    %c0_i32_0 = arith.constant 0 : i32
    %c0_i32_1 = arith.constant 0 : i32
    return %c0_i32, %c0_i32_0 : i32, i32
  }
  func.func @transform_2(%arg0: i32, %arg1: i32) -> (i32, i32) {
    %c0_i32 = arith.constant 0 : i32
    %c0_i32_0 = arith.constant 0 : i32
    %c0_i32_1 = arith.constant 0 : i32
    return %c0_i32, %c0_i32_0 : i32, i32
  }
  func.func @transform_3(%arg0: i32, %arg1: i32) -> (i32, i32, i32, i32) {
    %c0_i32 = arith.constant 0 : i32
    %c0_i32_0 = arith.constant 0 : i32
    %c0_i32_1 = arith.constant 0 : i32
    return %arg0, %c0_i32, %arg1, %c0_i32_0 : i32, i32, i32, i32
  }
  func.func @transform_4(%arg0: i32, %arg1: i32) -> (i32, i32, i32, i32) {
    %c0_i32 = arith.constant 0 : i32
    %c0_i32_0 = arith.constant 0 : i32
    %c0_i32_1 = arith.constant 0 : i32
    return %arg0, %c0_i32, %arg1, %c0_i32_0 : i32, i32, i32, i32
  }
  func.func @transform_5(%arg0: i32, %arg1: i32) -> (i32, i32, i32, i32) {
    %c0_i32 = arith.constant 0 : i32
    %c0_i32_0 = arith.constant 0 : i32
    %c0_i32_1 = arith.constant 0 : i32
    return %arg0, %c0_i32, %arg1, %c0_i32_0 : i32, i32, i32, i32
  }
}

</mosaic_0001>

<bundles_post_ra>
// kernel: self_attention_pallas.2
= control target key start
LH: loop header
LB: loop body
LE: loop exit
PB: predicated region body
PF: predicated region fallthrough
CT: control target
= control target key end

     0   :  { %s752_s18 = smov 0   ;;  %s754_s19 = smov 0   ;;  %s823_s0 = inlined_call_operand.vmem [shape: bf16[2,8,32], index: 0, kind: input, shape index: {}]   ;;  %s824_s1 = inlined_call_operand.vmem [shape: bf16[32,96], index: 1, kind: input, shape index: {}]   ;;  %s825_s2 = inlined_call_operand.vmem [shape: f32[1,96], index: 2, kind: input, shape index: {}]   ;;  %s826_s3 = inlined_call_operand.vmem [shape: bf16[2,4,8,8], index: 3, kind: output, shape index: {0}]   ;;  %s827_s4 = inlined_call_operand.vmem [shape: bf16[2,4,8,8], index: 4, kind: output, shape index: {1}]   ;;  %s828_s5 = inlined_call_operand.vmem [shape: bf16[2,4,8,8], index: 5, kind: output, shape index: {2}]  }
   0x1   :  { %s756_s20 = smov 0  }
   0x2 LB: > { %s28_s21 = sadd.s32 1, %s703_s19  ;;  %p605_p0 = scmp.ge.s32.totalorder %s707_s20, 1  ;;  %s707_s20 = sphi %s756_s20, %s16_s20   ;;  %s703_s19 = sphi %s754_s19, %s830_s19   ;;  %s699_s18 = sphi %s752_s18, %s829_s18  }
   0x3   : > { %p30_p1 = scmp.ge.s32.totalorder %s28_s21, 2  ;;  %p214_p2 = scmp.lt.s32.totalorder %s707_s20, 3 }
   0x5   : > { %s832_s21 = smov (%p30_p1, %s28_s21), 0  ;;  %p215_p3 = pnand %p605_p0, %p214_p2 }
   0x6   : > { %p263_p4 = scmp.lt.s32.totalorder (!%p215_p3), %s699_s18, 1  ;;  %s711_s11 = smov (!%p215_p3), 88  }
   0x7   : > { %218 = sbr.rel (%p215_p3) target bundleno = 354 (0x162), region = 32  ;;  %s712_s12 = smov (!%p215_p3), 96  }
   0x8   : > { %s713_s13 = smov (!%p215_p3), 48   ;;  %s714_s14 = smov (!%p215_p3), 64  }
   0x9   : > { %s715_s15 = smov (!%p215_p3), 56   ;;  %s716_s16 = smov (!%p215_p3), 120  }
   0xa   : > { %s717_s17 = smov (!%p215_p3), 80   ;;  %s719_s22 = smov (!%p215_p3), 104  }
   0xb   : > { %s720_s23 = smov (!%p215_p3), 72   ;;  %s721_s24 = smov (!%p215_p3), 40  }
   0xc   : > { %v683_v0 = vld [vmem:[%s824_s1 + $0x8] sm:$0xff]   ;;  %v709_v1 = vmov 0.0   ;;  %v684_v2 = vld [vmem:[%s824_s1] sm:$0xff]   ;;  %vm710_vm0 = vmmov 0   ;;  %s834_s18 = smov (!%p263_p4, %s699_s18), 1  ;;  %vm319_vm1 = vcmask 261120  }
   0xd   : > { %638 = vmatprep.subr.bf16.mxu0 %v709_v1  ;;  %642 = vmatprep.mubr.msk.bf16.mxu0 %vm710_vm0, %v709_v1  ;;  %s606_s26 = sshll.u32 %s834_s18, 2  ;;  %v613_v4 = vld [vmem:[%s825_s2] ss:$0 sm:$0xff]  ;;  %s782_s7 = sshll.u32 %s834_s18, 4  ;;  %vm365_vm2 = vcmask 60416  }
   0xe   : > { %639 = vmatpush3.bf16.msra.mxu0 %v683_v0  ;;  %s269_s29 = scalar_lea.vmem %s823_s0, %s606_s26  ;;  %s788_s10 = scalar_lea.vmem %s826_s3, %s782_s7 }
   0xf   : > { %640 = vmatprep.subr.bf16.mxu0 %v709_v1  ;;  %v295_v3 = vld [vmem:[%s269_s29] sm:$0xf]  ;;  %s718_s18 = smov 112   ;;  %s285_s27 = scalar_lea.vmem %s827_s4, %s782_s7 }
  0x10   : > { %s293_s30 = scalar_lea.vmem %s828_s5, %s782_s7 }
  0x12   : > { %641 = vmatpush3.bf16.msra.mxu0 %v684_v2 }
  0x15   : > { %643 = vmatmul.mubr.msk.bf16.vlgmr.msra.gmra.mxu0 %vm319_vm1, %v295_v3 }
  0xd5   : > { %v357_v5 = vpop.f32.mrf.mxu0 }
  0xd6   : > { %v358_v6 = vadd.f32 %v613_v4, %v357_v5 }
  0xd7   : > { %v644_v7 = vpop.f32.mrf.mxu0 }
  0xd8   : > { %v363_v8 = vmul.f32 0.35355338, %v358_v6  ;;  %v633_v9 = vpack.c.bf16 %v358_v6, %v358_v6 }
  0xd9   : > { %v360_v10 = vpop.f32.mrf.mxu0 }
  0xda   : > { %v364_v11 = vpack.c.bf16 %v363_v8, %v363_v8  ;;  %387 = vrot.lane.b32.xlu1 %v633_v9, %s711_s11  ;;  %371 = vrot.lane.b32.xlu0 %v633_v9, %s712_s12 }
  0xdb   : > { %v645_v12 = vpop.f32.mrf.mxu0 }
  0xdc   : > { %366 = vst.msk [vmem:[%s788_s10] sm:$0xf] %vm365_vm2, %v364_v11 }
  0xde   : > { %407 = vrot.lane.b32.xlu1 %v633_v9, %s713_s13  ;;  %375 = vrot.lane.b32.xlu0 %v633_v9, %s714_s14 }
  0xe2   : > { %392 = vrot.lane.b32.xlu0 %v633_v9, %s715_s15  ;;  %382 = vrot.lane.b32.xlu1 %v364_v11, %s716_s16 }
  0xe6   : > { %402 = vrot.lane.b32.xlu0 %v633_v9, %s717_s17  ;;  %397 = vrot.lane.b32.xlu1 %v364_v11, %s718_s18 }
  0xea   : > { %412 = vrot.lane.b32.xlu0 %v364_v11, %s719_s22  ;;  %417 = vrot.lane.b32.xlu1 %v633_v9, %s720_s23 }
  0xee   : > { %422 = vrot.lane.b32.xlu0 %v633_v9, %s721_s24 }
 0x14c   : > { %v388_v13 = vpop.permute.xlu1 %387  ;;  %v372_v14 = vpop.permute.xlu0 %371 }
 0x14d   : > { %620 = vst.msk [vmem:[%s285_s27 + $0x4] sm:$0xf] %vm365_vm2, %v388_v13  ;;  %374 = vst.msk [vmem:[%s285_s27] sm:$0xf] %vm365_vm2, %v372_v14 }
 0x150   : > { %v408_v15 = vpop.permute.xlu1 %407  ;;  %v376_v16 = vpop.permute.xlu0 %375 }
 0x151   : > { %624 = vst.msk [vmem:[%s293_s30 + $0x8] sm:$0xf] %vm365_vm2, %v408_v15  ;;  %378 = vst.msk [vmem:[%s293_s30] sm:$0xf] %vm365_vm2, %v376_v16 }
 0x154   : > { %v393_v17 = vpop.permute.xlu0 %392  ;;  %v383_v18 = vpop.permute.xlu1 %382 }
 0x155   : > { %621 = vst.msk [vmem:[%s293_s30 + $0x4] sm:$0xf] %vm365_vm2, %v393_v17  ;;  %619 = vst.msk [vmem:[%s788_s10 + $0x4] sm:$0xf] %vm365_vm2, %v383_v18 }
 0x158   : > { %v403_v19 = vpop.permute.xlu0 %402  ;;  %v398_v20 = vpop.permute.xlu1 %397 }
 0x159   : > { %623 = vst.msk [vmem:[%s285_s27 + $0x8] sm:$0xf] %vm365_vm2, %v403_v19  ;;  %622 = vst.msk [vmem:[%s788_s10 + $0x8] sm:$0xf] %vm365_vm2, %v398_v20 }
 0x15c   : > { %v413_v21 = vpop.permute.xlu0 %412  ;;  %v418_v22 = vpop.permute.xlu1 %417 }
 0x15d   : > { %625 = vst.msk [vmem:[%s788_s10 + $0xc] sm:$0xf] %vm365_vm2, %v413_v21  ;;  %626 = vst.msk [vmem:[%s285_s27 + $0xc] sm:$0xf] %vm365_vm2, %v418_v22 }
 0x160   : > { %v423_v23 = vpop.permute.xlu0 %422 }
 0x161   : > { %627 = vst.msk [vmem:[%s293_s30 + $0xc] sm:$0xf] %vm365_vm2, %v423_v23 }
 0x162 PF: > { %s16_s20 = sadd.s32 1, %s707_s20   ;;  %s829_s18 = smov %s703_s19 }
 0x163   : > { %p13_p5 = scmp.ge.s32.totalorder %s16_s20, 4   ;;  %s830_s19 = smov %s832_s21 }
 0x165   :  { %15 = sbr.rel (!%p13_p5) target bundleno = 2 (0x2), region = 95 }

// kernel: self_attention_pallas.3
= control target key start
LH: loop header
LB: loop body
LE: loop exit
PB: predicated region body
PF: predicated region fallthrough
CT: control target
= control target key end

     0   :  { %10 = vsyncpa [#allocation6], 0  ;;  %s1848_s0 = inlined_call_operand.vmem [shape: bf16[2,4,8,8], index: 0, kind: input, shape index: {}]   ;;  %s1849_s1 = inlined_call_operand.vmem [shape: bf16[2,4,8,8], index: 1, kind: input, shape index: {}]   ;;  %s1850_s2 = inlined_call_operand.vmem [shape: bf16[2,4,8,8], index: 2, kind: input, shape index: {}]   ;;  %s1851_s3 = inlined_call_operand.vmem [shape: bf16[32,32], index: 3, kind: input, shape index: {}]   ;;  %s1852_s4 = inlined_call_operand.vmem [shape: f32[1,32], index: 4, kind: input, shape index: {}]   ;;  %s1853_s5 = inlined_call_operand.hbm [shape: f32[2,8,32], index: 5, kind: output, shape index: {}]  }
   0x1   :  { %12 = vsyncpa [#allocation6 + $0x1], 0  ;;  %s1552_s18 = smov 0   ;;  %s1554_s19 = smov 0  }
   0x2   :  { %s1556_s20 = smov 0   ;;  %s1558_s21 = smov 0  }
   0x3   :  { %s1560_s22 = smov 0   ;;  %s1562_s23 = smov 0  }
   0x4 LB: > { %s1226_s24 = sadd.s32 4294967295, %s1515_s23   ;;  %s1227_s25 = sadd.s32 4294967294, %s1515_s23   ;;  %s1515_s23 = sphi %s1562_s23, %s18_s23   ;;  %s1511_s22 = sphi %s1560_s22, %s1860_s22   ;;  %s1507_s21 = sphi %s1558_s21, %s1859_s21   ;;  %s1503_s20 = sphi %s1556_s20, %s1858_s20   ;;  %s1499_s19 = sphi %s1554_s19, %s1857_s19   ;;  %s1495_s18 = sphi %s1552_s18, %s1856_s18  }
   0x5   : > { %s37_s26 = sadd.s32 1, %s1511_s22  ;;  %s172_s27 = sadd.s32 1, %s1503_s20 }
   0x6   : > { %p39_p0 = scmp.ge.s32.totalorder %s37_s26, 2  ;;  %p182_p1 = scmp.ne.s32.totalorder %s1503_s20, %s1499_s19 }
   0x7   : > { %p183_p2 = scmp.eq.s32.totalorder %s1226_s24, 1  ;;  %p188_p3 = scmp.ne.s32.totalorder %s1499_s19, %s1495_s18 }
   0x8   : > { %s1862_s26 = smov (%p39_p0, %s37_s26), 0  ;;  %p189_p5 = scmp.eq.s32.totalorder %s1227_s25, 1 }
   0x9   : > { %p1592_p4 = por %p183_p2, %p182_p1  ;;  %s167_s29 = ssub.s32 %s1511_s22, %s1862_s26 }
   0xa   : > { %p1230_p6 = scmp.ge.s32.totalorder %s1515_s23, 1  ;;  %p170_p7 = scmp.eq.s32.totalorder %s167_s29, 0 }
   0xb   : > { %p1599_p8 = por %p189_p5, %p188_p3  ;;  %p246_p9 = scmp.lt.s32.totalorder %s1515_s23, 3 }
   0xc   : > { %s1605_s6 = scalar_select %p170_p7, %s1503_s20, %s172_s27  }
   0xd   : > { %p247_p10 = pnand %p1230_p6, %p246_p9 }
   0xe   : > { %p293_p11 = scmp.lt.s32.totalorder (!%p247_p10), %s1507_s21, 1  ;;  %s1252_s15 = sshll.u32 (!%p247_p10), %s1507_s21, 7 }
   0xf   : > { %250 = sbr.rel (%p247_p10) target bundleno = 1024 (0x400), region = 40  ;;  %s1802_s27 = scalar_lea.hbm (!%p247_p10), %s1853_s5, %s1252_s15 }
  0x14   : > { %vm331_vm0 = vcmask 64512   ;;  %v1517_v0 = vmov 0.0   ;;  %s294_s7 = scalar_select %p293_p11, %s1507_s21, 1  ;;  %vm1518_vm1 = vmmov 0   ;;  %vm322_vm2 = vcmask 7168  }
  0x15   : > { %1282 = vmatprep.subr.bf16.mxu0 %v1517_v0  ;;  %1288 = vmatprep.subr.bf16.mxu1 %v1517_v0  ;;  %332 = vst.msk [vmem:[#allocation4] sm:$0xff] %vm331_vm0, %v1517_v0  ;;  %333 = vst.msk [vmem:[#allocation4 + $0x8] sm:$0xff] %vm331_vm0, %v1517_v0  ;;  %v1519_v13 = vmov -1e+30   ;;  %v1520_v32 = vmov 0   ;;  %vm661_vm3 = vcmask 1043456  }
  0x16   : > { %334 = vst.msk [vmem:[#allocation4 + $0x10] sm:$0xff] %vm331_vm0, %v1517_v0  ;;  %335 = vst.msk [vmem:[#allocation4 + $0x18] sm:$0xff] %vm331_vm0, %v1517_v0  ;;  %1284 = vmatprep.mubr.msk.bf16.mxu0 %vm1518_vm1, %v1517_v0  ;;  %1290 = vmatprep.mubr.msk.bf16.mxu1 %vm1518_vm1, %v1517_v0  ;;  %s1623_s8 = sshll.u32 %s294_s7, 4  ;;  %vm1096_vm4 = vcmask 261120   ;;  %s1521_s7 = smov [#allocation5]  }
  0x17   : > { %s308_s11 = scalar_lea.vmem %s1849_s1, %s1623_s8  ;;  %s300_s14 = scalar_lea.vmem %s1848_s0, %s1623_s8  ;;  %323 = vst.msk [vmem:[#allocation2] sm:$0xff] %vm322_vm2, %v1519_v13  ;;  %324 = vst.msk [vmem:[#allocation2 + $0x8] sm:$0xff] %vm322_vm2, %v1519_v13  ;;  %1413 = vset.pattern.permute.xlu0 %v1520_v32  ;;  %1414 = vset.pattern.permute.xlu1 %v1520_v32 }
  0x18   : > { %v340_v1 = vld [vmem:[%s308_s11] sm:$0xf]  ;;  %v341_v2 = vld [vmem:[%s308_s11 + $0x4] sm:$0xf]  ;;  %v342_v5 = vld [vmem:[%s308_s11 + $0x8] sm:$0xf]  ;;  %s1714_s17 = scalar_lea.vmem %s1850_s2, %s1623_s8 }
  0x19   : > { %v353_v3 = vsel %vm331_vm0, %v340_v1, 0  ;;  %v399_v4 = vsel %vm331_vm0, %v341_v2, 0  ;;  %v343_v6 = vld [vmem:[%s308_s11 + $0xc] sm:$0xf]  ;;  %v336_v7 = vld [vmem:[%s300_s14] sm:$0xf] }
  0x1a   : > { %1283 = vmatpush3.bf16.xpose.msra.mxu0 %v353_v3  ;;  %1289 = vmatpush3.bf16.xpose.msra.mxu1 %v399_v4  ;;  %v337_v8 = vld [vmem:[%s300_s14 + $0x4] sm:$0xf]  ;;  %v445_v9 = vsel %vm331_vm0, %v342_v5, 0  ;;  %v491_v10 = vsel %vm331_vm0, %v343_v6, 0  ;;  %v338_v11 = vld [vmem:[%s300_s14 + $0x8] sm:$0xf] }
  0x1b   : > { %1294 = vmatprep.subr.bf16.mxu0 %v1517_v0  ;;  %1300 = vmatprep.subr.bf16.mxu1 %v1517_v0  ;;  %v339_v12 = vld [vmem:[%s300_s14 + $0xc] sm:$0xf]  ;;  %325 = vst.msk [vmem:[#allocation2 + $0x10] sm:$0xff] %vm322_vm2, %v1519_v13  ;;  %326 = vst.msk [vmem:[#allocation2 + $0x18] sm:$0xff] %vm322_vm2, %v1519_v13  ;;  %v344_v50 = vld [vmem:[%s1714_s17] sm:$0xf] }
  0x1c   : > { %327 = vst.msk [vmem:[#allocation3] sm:$0xff] %vm322_vm2, %v1517_v0  ;;  %328 = vst.msk [vmem:[#allocation3 + $0x8] sm:$0xff] %vm322_vm2, %v1517_v0  ;;  %v663_v52 = vsel %vm661_vm3, %v344_v50, 0  ;;  %v345_v53 = vld [vmem:[%s1714_s17 + $0x4] sm:$0xf]  ;;  %s290_s11 = sand.u32 1, %s1499_s19  }
  0x1d   : > { %329 = vst.msk [vmem:[#allocation3 + $0x10] sm:$0xff] %vm322_vm2, %v1517_v0  ;;  %330 = vst.msk [vmem:[#allocation3 + $0x18] sm:$0xff] %vm322_vm2, %v1517_v0  ;;  %v709_v54 = vsel %vm661_vm3, %v345_v53, 0  ;;  %v346_v4 = vld [vmem:[%s1714_s17 + $0x8] sm:$0xf]  ;;  %s1231_s12 = sshll.u32 %s290_s11, 3 }
  0x1e   : > { %v1675_v35 = vld [vmem:[#allocation2] sm:$0xff]  ;;  %v1680_v38 = vld [vmem:[#allocation2 + $0x8] sm:$0xff]  ;;  %s292_s16 = scalar_lea.vmem [#allocation5], %s1231_s12  ;;  %s1099_s21 = scalar_lea.sflag [#allocation6], %s290_s11 }
  0x1f   : > { %v897_v50 = vld [vmem:[%s1851_s3 + $0x4] sm:$0xf]  ;;  %s1443_s8 = sshll.u32 %s1521_s7, 4  ;;  %s1444_s8 = int_to_ptr.vmem [resolvable:$false] %s1443_s8 }
  0x20   : > { %s1445_s9 = scalar_lea.vmem %s1444_s8, 256 }
  0x21   : > { %1285 = vmatmul.mubr.msk.bf16.vlgmr.msra.gmra.mxu0 %vm331_vm0, %v336_v7  ;;  %1291 = vmatmul.mubr.msk.bf16.vlgmr.msra.gmra.mxu1 %vm331_vm0, %v337_v8  ;;  %v755_v8 = vsel %vm661_vm3, %v346_v4, 0 }
  0x22   : > { %1295 = vmatpush3.bf16.xpose.msra.mxu0 %v445_v9  ;;  %1301 = vmatpush3.bf16.xpose.msra.mxu1 %v491_v10  ;;  %v1690_v42 = vld [vmem:[#allocation2 + $0x10] sm:$0xff]  ;;  %v1700_v46 = vld [vmem:[#allocation2 + $0x18] sm:$0xff]  ;;  %v347_v9 = vld [vmem:[%s1714_s17 + $0xc] sm:$0xf]  ;;  %s1113_s17 = sshll.u32 %s292_s16, 4  ;;  %s1804_s17 = int_to_ptr.vmem [resolvable:$true] %s1113_s17 }
  0x23   : > { %1296 = vmatprep.mubr.msk.bf16.mxu0 %vm1518_vm1, %v1517_v0  ;;  %1302 = vmatprep.mubr.msk.bf16.mxu1 %vm1518_vm1, %v1517_v0  ;;  %v801_v13 = vsel %vm661_vm3, %v347_v9, 0  ;;  %s1439_s29 = scalar_lea.vmem %s1804_s17, 128  ;;  %p1446_p1 = scmp.lt.s32.totalorder %s1804_s17, %s1444_s8 }
  0x24   : > { %1306 = vmatprep.subr.bf16.mxu0 %v1517_v0  ;;  %1312 = vmatprep.subr.bf16.mxu1 %v1517_v0  ;;  %p1440_p12 = scmp.ne.s32.totalorder %s1804_s17, %s1439_s29  ;;  %p1447_p2 = scmp.lt.s32.totalorder %s1445_s9, %s1439_s29 }
  0x26   : > { %p1441_p13 = pnand %p1440_p12, %p1592_p4  ;;  %p1448_p3 = por %p1447_p2, %p1446_p1 }
  0x28   : > { %p1442_p0 = pneg %p1441_p13 }
  0x29   : > { %1297 = vmatmul.mubr.msk.bf16.vlgmr.msra.gmra.mxu0 %vm331_vm0, %v338_v11  ;;  %1303 = vmatmul.mubr.msk.bf16.vlgmr.msra.gmra.mxu1 %vm331_vm0, %v339_v12 }
  0x2a   : > { %1308 = vmatprep.mubr.msk.bf16.mxu0 %vm1518_vm1, %v1517_v0  ;;  %1314 = vmatprep.mubr.msk.bf16.mxu1 %vm1518_vm1, %v1517_v0  ;;  %p1449_p5 = pnand %p1448_p3, %p1442_p0 }
  0x2b   : > { %1307 = vmatpush3.bf16.msra.mxu0 %v663_v52  ;;  %1313 = vmatpush3.bf16.msra.mxu1 %v709_v54  ;;  %v902_v52 = vsel %vm661_vm3, %v897_v50, 0 }
  0x2c   : > { %1318 = vmatprep.subr.bf16.mxu0 %v1517_v0  ;;  %1324 = vmatprep.subr.bf16.mxu1 %v1517_v0 }
  0xe1   : > { %v1665_v14 = vpop.f32.mrf.mxu0  ;;  %v1667_v15 = vpop.f32.mrf.mxu1 }
  0xe2   : > { %v537_v16 = vsel %vm331_vm0, %v1665_v14, -inf  ;;  %v540_v19 = vsel %vm331_vm0, %v1667_v15, -inf }
  0xe3   : > { %v1292_v17 = vpop.f32.mrf.mxu1  ;;  %538 = vmax.xlane.f32.xlu0 %v537_v16  ;;  %v1286_v18 = vpop.f32.mrf.mxu0 }
  0xe5   : > { %v392_v20 = vpop.f32.mrf.mxu0  ;;  %v438_v21 = vpop.f32.mrf.mxu1 }
  0xe7   : > { %v1293_v22 = vpop.f32.mrf.mxu1  ;;  %541 = vmax.xlane.f32.xlu0 %v540_v19  ;;  %v1287_v23 = vpop.f32.mrf.mxu0 }
  0xe9   : > { %v481_v24 = vpop.f32.mrf.mxu0  ;;  %v527_v25 = vpop.f32.mrf.mxu1 }
  0xea   : > { %v543_v26 = vsel %vm331_vm0, %v481_v24, -inf  ;;  %v546_v29 = vsel %vm331_vm0, %v527_v25, -inf }
  0xeb   : > { %v1304_v27 = vpop.f32.mrf.mxu1  ;;  %544 = vmax.xlane.f32.xlu1 %v543_v26  ;;  %v1298_v28 = vpop.f32.mrf.mxu0 }
  0xec   : > { %v597_v28 = vld [vmem:[#allocation3] sm:$0xff] }
  0xed   : > { %v484_v30 = vpop.f32.mrf.mxu0  ;;  %v530_v31 = vpop.f32.mrf.mxu1 }
  0xee   : > { %v598_v31 = vld [vmem:[#allocation3 + $0x8] sm:$0xff] }
  0xef   : > { %v1305_v33 = vpop.f32.mrf.mxu1  ;;  %547 = vmax.xlane.f32.xlu1 %v546_v29  ;;  %v1299_v34 = vpop.f32.mrf.mxu0 }
 0x16c   : > { %v539_v36 = vpop.xlane.xlu0 %538 }
 0x16d   : > { %v1678_v37 = vmax.f32 %v1675_v35, %v539_v36 }
 0x16f   : > { %v553_v39 = vsub.f32 %v1675_v35, %v1678_v37  ;;  %851 = vst.msk [vmem:[#allocation2] sm:$0xff] %vm322_vm2, %v1678_v37  ;;  %567 = vperm.xlu0 %1413, %v1678_v37   ;;  %v599_v35 = vld [vmem:[#allocation3 + $0x10] sm:$0xff] }
 0x170   : > { %v542_v40 = vpop.xlane.xlu0 %541 }
 0x171   : > { %v1688_v41 = vmax.f32 %v1680_v38, %v542_v40 }
 0x173   : > { %v554_v43 = vsub.f32 %v1680_v38, %v1688_v41  ;;  %852 = vst.msk [vmem:[#allocation2 + $0x8] sm:$0xff] %vm322_vm2, %v1688_v41  ;;  %572 = vperm.xlu1 %1414, %v1688_v41  }
 0x174   : > { %v545_v44 = vpop.xlane.xlu1 %544 }
 0x175   : > { %v1698_v45 = vmax.f32 %v1690_v42, %v545_v44  ;;  %v559_v19 = vmul.f32 1.442695, %v554_v43 }
 0x177   : > { %v555_v47 = vsub.f32 %v1690_v42, %v1698_v45  ;;  %853 = vst.msk [vmem:[#allocation2 + $0x10] sm:$0xff] %vm322_vm2, %v1698_v45  ;;  %577 = vperm.xlu1 %1414, %v1698_v45  }
 0x178   : > { %v548_v48 = vpop.xlane.xlu1 %547 }
 0x179   : > { %v1708_v49 = vmax.f32 %v1700_v46, %v548_v48  ;;  %v561_v22 = vmul.f32 1.442695, %v555_v47  ;;  %v895_v47 = vld [vmem:[%s1851_s3] sm:$0xf] }
 0x17a   : > { %v948_v48 = vsel %vm661_vm3, %v895_v47, 0 }
 0x17b   : > { %v556_v51 = vsub.f32 %v1700_v46, %v1708_v49  ;;  %854 = vst.msk [vmem:[#allocation2 + $0x18] sm:$0xff] %vm322_vm2, %v1708_v49  ;;  %582 = vperm.xlu1 %1414, %v1708_v49  }
 0x17d   : > { %v563_v23 = vmul.f32 1.442695, %v556_v51 }
 0x1ea   : > { %v568_v55 = vpop.permute.xlu0 %567 }
 0x1eb   : > { %v585_v56 = vsub.f32 %v1665_v14, %v568_v55  ;;  %v557_v14 = vmul.f32 1.442695, %v553_v39  ;;  %v600_v39 = vld [vmem:[#allocation3 + $0x18] sm:$0xff] }
 0x1ed   : > { %v589_v57 = vmul.f32 1.442695, %v585_v56 }
 0x1ee   : > { %v573_v58 = vpop.permute.xlu1 %572 }
 0x1ef   : > { %1415 = vpow2.f32 %v589_v57  ;;  %v586_v59 = vsub.f32 %v1667_v15, %v573_v58  ;;  %v626_v57 = vld [vmem:[#allocation4] sm:$0xff] }
 0x1f1   : > { %v591_v60 = vmul.f32 1.442695, %v586_v59 }
 0x1f2   : > { %v578_v61 = vpop.permute.xlu1 %577 }
 0x1f3   : > { %1417 = vpow2.f32 %v591_v60  ;;  %v587_v62 = vsub.f32 %v481_v24, %v578_v61  ;;  %v627_v60 = vld [vmem:[#allocation4 + $0x8] sm:$0xff] }
 0x1f5   : > { %v593_v63 = vmul.f32 1.442695, %v587_v62 }
 0x1f6   : > { %v583_v1 = vpop.permute.xlu1 %582 }
 0x1f7   : > { %1419 = vpow2.f32 %v593_v63  ;;  %v588_v2 = vsub.f32 %v527_v25, %v583_v1 }
 0x1f9   : > { %v595_v3 = vmul.f32 1.442695, %v588_v2 }
 0x1fb   : > { %1421 = vpow2.f32 %v595_v3  ;;  %v628_v3 = vld [vmem:[#allocation4 + $0x10] sm:$0xff] }
 0x1fc   : > { %v1416_v5 = vpop.eup %1415  ;;  %1423 = vpow2.f32 %v557_v14 }
 0x1fd   : > { %v605_v6 = vsel %vm331_vm0, %v1416_v5, 0.0  ;;  %v654_v7 = vpack.c.bf16 %v1416_v5, %v1416_v5  ;;  %1425 = vpow2.f32 %v559_v19 }
 0x1fe   : > { %606 = vadd.xlane.f32.xlu0 %v605_v6  ;;  %1427 = vpow2.f32 %v561_v22 }
 0x1ff   : > { %1309 = vmatmul.mubr.msk.bf16.vlgmr.msra.gmra.mxu0 %vm331_vm0, %v654_v7  ;;  %1429 = vpow2.f32 %v563_v23 }
 0x200   : > { %v1418_v10 = vpop.eup %1417  ;;  %1319 = vmatpush3.bf16.msra.mxu0 %v755_v8  ;;  %1320 = vmatprep.mubr.msk.bf16.mxu0 %vm1518_vm1, %v1517_v0 }
 0x201   : > { %v608_v11 = vsel %vm331_vm0, %v1418_v10, 0.0  ;;  %v655_v12 = vpack.c.bf16 %v1418_v10, %v1418_v10  ;;  %1330 = vmatprep.subr.bf16.mxu0 %v1517_v0 }
 0x202   : > { %609 = vadd.xlane.f32.xlu1 %v608_v11  ;;  %v629_v11 = vld [vmem:[#allocation4 + $0x18] sm:$0xff] }
 0x203   : > { %1315 = vmatmul.mubr.msk.bf16.vlgmr.msra.gmra.mxu1 %vm331_vm0, %v655_v12 }
 0x204   : > { %v1420_v15 = vpop.eup %1419  ;;  %1325 = vmatpush3.bf16.msra.mxu1 %v801_v13  ;;  %1326 = vmatprep.mubr.msk.bf16.mxu1 %vm1518_vm1, %v1517_v0 }
 0x205   : > { %v611_v16 = vsel %vm331_vm0, %v1420_v15, 0.0  ;;  %v656_v17 = vpack.c.bf16 %v1420_v15, %v1420_v15  ;;  %1336 = vmatprep.subr.bf16.mxu1 %v1517_v0 }
 0x206   : > { %612 = vadd.xlane.f32.xlu1 %v611_v16 }
 0x207   : > { %1321 = vmatmul.mubr.msk.bf16.vlgmr.msra.gmra.mxu0 %vm331_vm0, %v656_v17 }
 0x208   : > { %v1422_v18 = vpop.eup %1421  ;;  %1332 = vmatprep.mubr.msk.bf16.mxu0 %vm1518_vm1, %v1517_v0  ;;  %1331 = vmatpush3.bf16.msra.mxu0 %v902_v52 }
 0x209   : > { %v614_v20 = vsel %vm331_vm0, %v1422_v18, 0.0  ;;  %v657_v21 = vpack.c.bf16 %v1422_v18, %v1422_v18  ;;  %v1424_v24 = vpop.eup %1423  ;;  %1342 = vmatprep.subr.bf16.mxu0 %v1517_v0 }
 0x20a   : > { %615 = vadd.xlane.f32.xlu1 %v614_v20  ;;  %v1426_v25 = vpop.eup %1425  ;;  %v601_v29 = vmul.f32 %v1424_v24, %v597_v28 }
 0x20b   : > { %1327 = vmatmul.mubr.msk.bf16.vlgmr.msra.gmra.mxu1 %vm331_vm0, %v657_v21  ;;  %v1428_v26 = vpop.eup %1427  ;;  %v602_v33 = vmul.f32 %v1426_v25, %v598_v31 }
 0x20c   : > { %1338 = vmatprep.mubr.msk.bf16.mxu1 %vm1518_vm1, %v1517_v0  ;;  %v1430_v27 = vpop.eup %1429  ;;  %v603_v37 = vmul.f32 %v1428_v26, %v599_v35  ;;  %1337 = vmatpush3.bf16.msra.mxu1 %v948_v48 }
 0x20d   : > { %v604_v42 = vmul.f32 %v1430_v27, %v600_v39  ;;  %1348 = vmatprep.subr.bf16.mxu1 %v1517_v0 }
 0x214   : > { %632 = vperm.xlu0 %1413, %v1424_v24  }
 0x21b   : > { %637 = vperm.xlu1 %1414, %v1426_v25  }
 0x21f   : > { %642 = vperm.xlu1 %1414, %v1428_v26  }
 0x223   : > { %647 = vperm.xlu1 %1414, %v1430_v27   ;;  %v1040_v27 = vld [vmem:[%s1851_s3 + $0xc] sm:$0xf] }
 0x287   : > { %v607_v30 = vpop.xlane.xlu0 %606 }
 0x288   : > { %v617_v32 = vadd.f32 %v607_v30, %v601_v29  ;;  %v1045_v30 = vsel %vm661_vm3, %v1040_v27, 0 }
 0x28a   : > { %622 = vst.msk [vmem:[#allocation3] sm:$0xff] %vm322_vm2, %v617_v32 }
 0x28b   : > { %v610_v34 = vpop.xlane.xlu1 %609 }
 0x28c   : > { %v618_v36 = vadd.f32 %v610_v34, %v602_v33  ;;  %v991_v33 = vld [vmem:[%s1851_s3 + $0x8] sm:$0xf] }
 0x28e   : > { %623 = vst.msk [vmem:[#allocation3 + $0x8] sm:$0xff] %vm322_vm2, %v618_v36  ;;  %v996_v36 = vsel %vm661_vm3, %v991_v33, 0 }
 0x28f   : > { %v613_v38 = vpop.xlane.xlu1 %612  ;;  %v633_v58 = vpop.permute.xlu0 %632 }
 0x290   : > { %v619_v40 = vadd.f32 %v613_v38, %v603_v37  ;;  %v650_v59 = vmul.f32 %v633_v58, %v626_v57 }
 0x291   : > { %v858_v41 = vld [vmem:[#allocation3] sm:$0xff] }
 0x292   : > { %624 = vst.msk [vmem:[#allocation3 + $0x10] sm:$0xff] %vm322_vm2, %v619_v40  ;;  %1431 = vrcp.f32 %v858_v41 }
 0x293   : > { %v616_v43 = vpop.xlane.xlu1 %615 }
 0x294   : > { %v620_v44 = vadd.f32 %v616_v43, %v604_v42 }
 0x295   : > { %v859_v45 = vld [vmem:[#allocation3 + $0x8] sm:$0xff] }
 0x296   : > { %625 = vst.msk [vmem:[#allocation3 + $0x18] sm:$0xff] %vm322_vm2, %v620_v44  ;;  %1433 = vrcp.f32 %v859_v45 }
 0x297   : > { %v638_v56 = vpop.permute.xlu1 %637 }
 0x298   : > { %v651_v2 = vmul.f32 %v638_v56, %v627_v60  ;;  %v1250_v56 = vld [vmem:[%s1852_s4] ss:$0 sm:$0xff] }
 0x299   : > { %v860_v46 = vld [vmem:[#allocation3 + $0x10] sm:$0xff] }
 0x29a   : > { %1435 = vrcp.f32 %v860_v46 }
 0x29b   : > { %v643_v62 = vpop.permute.xlu1 %642 }
 0x29c   : > { %v652_v9 = vmul.f32 %v643_v62, %v628_v3 }
 0x29d   : > { %v861_v49 = vld [vmem:[#allocation3 + $0x18] sm:$0xff] }
 0x29e   : > { %1437 = vrcp.f32 %v861_v49 }
 0x29f   : > { %v1432_v51 = vpop.eup %1431  ;;  %v648_v10 = vpop.permute.xlu1 %647 }
 0x2a0   : > { %872 = vperm.xlu0 %1413, %v1432_v51   ;;  %v653_v17 = vmul.f32 %v648_v10, %v629_v11 }
 0x2a3   : > { %v1434_v53 = vpop.eup %1433 }
 0x2a4   : > { %877 = vperm.xlu1 %1414, %v1434_v53  }
 0x2a7   : > { %v1436_v54 = vpop.eup %1435 }
 0x2a8   : > { %882 = vperm.xlu1 %1414, %v1436_v54  }
 0x2ab   : > { %v1438_v55 = vpop.eup %1437 }
 0x2ac   : > { %887 = vperm.xlu0 %1413, %v1438_v55  }
 0x2bf   : > { %v699_v61 = vpop.f32.mrf.mxu0 }
 0x2c0   : > { %v843_v63 = vadd.f32 %v699_v61, %v650_v59 }
 0x2c1   : > { %v1310_v1 = vpop.f32.mrf.mxu0 }
 0x2c2   : > { %847 = vst.msk [vmem:[#allocation4] sm:$0xff] %vm331_vm0, %v843_v63 }
 0x2c3   : > { %v702_v4 = vpop.f32.mrf.mxu0  ;;  %v745_v5 = vpop.f32.mrf.mxu1 }
 0x2c4   : > { %v844_v6 = vadd.f32 %v745_v5, %v651_v2 }
 0x2c5   : > { %v1311_v7 = vpop.f32.mrf.mxu0  ;;  %v1316_v8 = vpop.f32.mrf.mxu1 }
 0x2c6   : > { %848 = vst.msk [vmem:[#allocation4 + $0x8] sm:$0xff] %vm331_vm0, %v844_v6 }
 0x2c7   : > { %v748_v12 = vpop.f32.mrf.mxu1  ;;  %v791_v13 = vpop.f32.mrf.mxu0 }
 0x2c8   : > { %v845_v14 = vadd.f32 %v791_v13, %v652_v9 }
 0x2c9   : > { %v1317_v15 = vpop.f32.mrf.mxu1  ;;  %v1322_v16 = vpop.f32.mrf.mxu0  ;;  %v866_v26 = vld [vmem:[#allocation4] sm:$0xff] }
 0x2ca   : > { %849 = vst.msk [vmem:[#allocation4 + $0x10] sm:$0xff] %vm331_vm0, %v845_v14 }
 0x2cb   : > { %v794_v18 = vpop.f32.mrf.mxu0  ;;  %v837_v19 = vpop.f32.mrf.mxu1 }
 0x2cc   : > { %v846_v20 = vadd.f32 %v837_v19, %v653_v17 }
 0x2cd   : > { %v1323_v21 = vpop.f32.mrf.mxu0  ;;  %v1328_v22 = vpop.f32.mrf.mxu1  ;;  %v867_v31 = vld [vmem:[#allocation4 + $0x8] sm:$0xff] }
 0x2ce   : > { %850 = vst.msk [vmem:[#allocation4 + $0x18] sm:$0xff] %vm331_vm0, %v846_v20 }
 0x2cf   : > { %v840_v23 = vpop.f32.mrf.mxu1 }
 0x2d1   : > { %v1329_v24 = vpop.f32.mrf.mxu1  ;;  %v868_v38 = vld [vmem:[#allocation4 + $0x10] sm:$0xff] }
 0x2d5   : > { %v869_v41 = vld [vmem:[#allocation4 + $0x18] sm:$0xff] }
 0x31b   : > { %v873_v25 = vpop.permute.xlu0 %872 }
 0x31c   : > { %v890_v28 = vmul.f32 %v873_v25, %v866_v26 }
 0x31e   : > { %v894_v29 = vpack.c.bf16 %v890_v28, %v890_v28 }
 0x31f   : > { %v878_v32 = vpop.permute.xlu1 %877 }
 0x320   : > { %v891_v34 = vmul.f32 %v878_v32, %v867_v31  ;;  %1339 = vmatmul.mubr.msk.bf16.vlgmr.msra.gmra.mxu1 %vm331_vm0, %v894_v29 }
 0x321   : > { %1349 = vmatpush3.bf16.msra.mxu1 %v1045_v30  ;;  %1350 = vmatprep.mubr.msk.bf16.mxu1 %vm1518_vm1, %v1517_v0 }
 0x322   : > { %v896_v35 = vpack.c.bf16 %v891_v34, %v891_v34 }
 0x323   : > { %v883_v37 = vpop.permute.xlu1 %882 }
 0x324   : > { %1333 = vmatmul.mubr.msk.bf16.vlgmr.msra.gmra.mxu0 %vm331_vm0, %v896_v35  ;;  %v892_v39 = vmul.f32 %v883_v37, %v868_v38 }
 0x325   : > { %1343 = vmatpush3.bf16.msra.mxu0 %v996_v36  ;;  %1344 = vmatprep.mubr.msk.bf16.mxu0 %vm1518_vm1, %v1517_v0 }
 0x326   : > { %v990_v43 = vpack.c.bf16 %v892_v39, %v892_v39 }
 0x327   : > { %v888_v40 = vpop.permute.xlu0 %887 }
 0x328   : > { %v893_v42 = vmul.f32 %v888_v40, %v869_v41 }
 0x32a   : > { %v1039_v44 = vpack.c.bf16 %v893_v42, %v893_v42 }
 0x32c   : > { %1345 = vmatmul.mubr.msk.bf16.vlgmr.msra.gmra.mxu0 %vm331_vm0, %v990_v43  ;;  %1351 = vmatmul.mubr.msk.bf16.vlgmr.msra.gmra.mxu1 %vm331_vm0, %v1039_v44 }
 0x3e0   : > { %v984_v45 = vpop.f32.mrf.mxu1 }
 0x3e2   : > { %v1340_v46 = vpop.f32.mrf.mxu1 }
 0x3e4   : > { %v938_v47 = vpop.f32.mrf.mxu0  ;;  %v987_v48 = vpop.f32.mrf.mxu1 }
 0x3e5   : > { %v985_v52 = vadd.f32 %v984_v45, %v938_v47 }
 0x3e6   : > { %v1334_v49 = vpop.f32.mrf.mxu0  ;;  %v1341_v50 = vpop.f32.mrf.mxu1 }
 0x3e8   : > { %v941_v51 = vpop.f32.mrf.mxu0 }
 0x3ea   : > { %v1335_v0 = vpop.f32.mrf.mxu0 }
 0x3ec   : > { %v1032_v53 = vpop.f32.mrf.mxu0  ;;  %v1081_v54 = vpop.f32.mrf.mxu1 }
 0x3ed   : > { %v1038_v55 = vadd.f32 %v1032_v53, %v985_v52 }
 0x3ee   : > { %v1346_v57 = vpop.f32.mrf.mxu0  ;;  %v1352_v58 = vpop.f32.mrf.mxu1 }
 0x3ef   : > { %v1087_v59 = vadd.f32 %v1081_v54, %v1038_v55 }
 0x3f0   : > { %v1035_v60 = vpop.f32.mrf.mxu0  ;;  %v1084_v61 = vpop.f32.mrf.mxu1 }
 0x3f1   : > { %v1095_v62 = vadd.f32 %v1250_v56, %v1087_v59 }
 0x3f2   : > { %v1347_v63 = vpop.f32.mrf.mxu0  ;;  %v1353_v1 = vpop.f32.mrf.mxu1 }
 0x3f3   : > { %1097 = vst.msk [vmem:[%s292_s16] sm:$0xff] %vm1096_vm4, %v1095_v62 }
 0x3f4   : > { %1452 = shalt.err (!%p1449_p5)
}
 0x3f5   : > { %s1453_s10 = scalar_lea.hbm %s1802_s27, 128  ;;  %s1457_s13 = scalar_lea.hbm %s1853_s5, 256 }
 0x3f6   : > { %p1454_p6 = scmp.ne.s32.totalorder %s1802_s27, %s1453_s10  ;;  %p1458_p10 = scmp.lt.s32.totalorder %s1802_s27, %s1853_s5 }
 0x3f7   : > { %p1459_p11 = scmp.lt.s32.totalorder %s1457_s13, %s1453_s10 }
 0x3f8   : > { %p1455_p7 = pnand %p1454_p6, %p1592_p4 }
 0x3f9   : > { %p1460_p12 = por %p1459_p11, %p1458_p10 }
 0x3fa   : > { %p1456_p9 = pneg %p1455_p7 }
 0x3fc   : > { %p1461_p13 = pnand %p1460_p12, %p1456_p9 }
 0x3fe   : > { %1464 = shalt.err (!%p1461_p13)
}
 0x3ff   : > { %1354 = dma.vmem_to_hbm [thread:$0]  (%p1592_p4), %s1804_s17, 128, %s1802_s27, %s1099_s21  }
 0x400 PF: > { %p1360_p0 = scmp.ge.s32.totalorder %s1515_s23, 2  ;;  %s1125_s16 = sand.u32 1, %s1495_s18  }
 0x401   : > { %s1126_s24 = scalar_lea.sflag [#allocation6], %s1125_s16 }
 0x402   : > { %p1357_p1 = pnand %p1360_p0, %p1599_p8 }
 0x404   : > { %p1358_p2 = pneg %p1357_p1 }
 0x406   : > { %1490 = dma.done.wait (%p1358_p2), %s1126_s24, 128  }
 0x407   : > { %1492 = vsyncadd (%p1358_p2), %s1126_s24, 4294967168  ;;  %s18_s23 = sadd.s32 1, %s1515_s23   ;;  %s1856_s18 = smov %s1499_s19 }
 0x408   : > { %p15_p3 = scmp.ge.s32.totalorder %s18_s23, 4   ;;  %s1857_s19 = smov %s1503_s20 }
 0x409   : > { %s1858_s20 = smov %s1605_s6  ;;  %s1859_s21 = smov %s1511_s22 }
 0x40a   : > { %s1860_s22 = smov %s1862_s26  ;;  %17 = sbr.rel (!%p15_p3) target bundleno = 4 (0x4), region = 89 }
 0x40f   :  { %1131 = vsyncpa [#allocation6], 1 }
 0x410   :  { %1133 = vsyncpa [#allocation6 + $0x1], 1 }

// kernel: self_attention_pallas.2
= control target key start
LH: loop header
LB: loop body
LE: loop exit
PB: predicated region body
PF: predicated region fallthrough
CT: control target
= control target key end

     0   :  { %s752_s18 = smov 0   ;;  %s754_s19 = smov 0   ;;  %s823_s0 = inlined_call_operand.vmem [shape: bf16[2,8,32], index: 0, kind: input, shape index: {}]   ;;  %s824_s1 = inlined_call_operand.vmem [shape: bf16[32,96], index: 1, kind: input, shape index: {}]   ;;  %s825_s2 = inlined_call_operand.vmem [shape: f32[1,96], index: 2, kind: input, shape index: {}]   ;;  %s826_s3 = inlined_call_operand.vmem [shape: bf16[2,4,8,8], index: 3, kind: output, shape index: {0}]   ;;  %s827_s4 = inlined_call_operand.vmem [shape: bf16[2,4,8,8], index: 4, kind: output, shape index: {1}]   ;;  %s828_s5 = inlined_call_operand.vmem [shape: bf16[2,4,8,8], index: 5, kind: output, shape index: {2}]  }
   0x1   :  { %s756_s20 = smov 0  }
   0x2 LB: > { %s28_s21 = sadd.s32 1, %s703_s19  ;;  %p605_p0 = scmp.ge.s32.totalorder %s707_s20, 1  ;;  %s707_s20 = sphi %s756_s20, %s16_s20   ;;  %s703_s19 = sphi %s754_s19, %s830_s19   ;;  %s699_s18 = sphi %s752_s18, %s829_s18  }
   0x3   : > { %p30_p1 = scmp.ge.s32.totalorder %s28_s21, 2  ;;  %p214_p2 = scmp.lt.s32.totalorder %s707_s20, 3 }
   0x5   : > { %s832_s21 = smov (%p30_p1, %s28_s21), 0  ;;  %p215_p3 = pnand %p605_p0, %p214_p2 }
   0x6   : > { %p263_p4 = scmp.lt.s32.totalorder (!%p215_p3), %s699_s18, 1  ;;  %s711_s11 = smov (!%p215_p3), 88  }
   0x7   : > { %218 = sbr.rel (%p215_p3) target bundleno = 354 (0x162), region = 32  ;;  %s712_s12 = smov (!%p215_p3), 96  }
   0x8   : > { %s713_s13 = smov (!%p215_p3), 48   ;;  %s714_s14 = smov (!%p215_p3), 64  }
   0x9   : > { %s715_s15 = smov (!%p215_p3), 56   ;;  %s716_s16 = smov (!%p215_p3), 120  }
   0xa   : > { %s717_s17 = smov (!%p215_p3), 80   ;;  %s719_s22 = smov (!%p215_p3), 104  }
   0xb   : > { %s720_s23 = smov (!%p215_p3), 72   ;;  %s721_s24 = smov (!%p215_p3), 40  }
   0xc   : > { %v683_v0 = vld [vmem:[%s824_s1 + $0x8] sm:$0xff]   ;;  %v709_v1 = vmov 0.0   ;;  %v684_v2 = vld [vmem:[%s824_s1] sm:$0xff]   ;;  %vm710_vm0 = vmmov 0   ;;  %s834_s18 = smov (!%p263_p4, %s699_s18), 1  ;;  %vm319_vm1 = vcmask 261120  }
   0xd   : > { %638 = vmatprep.subr.bf16.mxu0 %v709_v1  ;;  %642 = vmatprep.mubr.msk.bf16.mxu0 %vm710_vm0, %v709_v1  ;;  %s606_s26 = sshll.u32 %s834_s18, 2  ;;  %v613_v4 = vld [vmem:[%s825_s2] ss:$0 sm:$0xff]  ;;  %s782_s7 = sshll.u32 %s834_s18, 4  ;;  %vm365_vm2 = vcmask 60416  }
   0xe   : > { %639 = vmatpush3.bf16.msra.mxu0 %v683_v0  ;;  %s269_s29 = scalar_lea.vmem %s823_s0, %s606_s26  ;;  %s788_s10 = scalar_lea.vmem %s826_s3, %s782_s7 }
   0xf   : > { %640 = vmatprep.subr.bf16.mxu0 %v709_v1  ;;  %v295_v3 = vld [vmem:[%s269_s29] sm:$0xf]  ;;  %s718_s18 = smov 112   ;;  %s285_s27 = scalar_lea.vmem %s827_s4, %s782_s7 }
  0x10   : > { %s293_s30 = scalar_lea.vmem %s828_s5, %s782_s7 }
  0x12   : > { %641 = vmatpush3.bf16.msra.mxu0 %v684_v2 }
  0x15   : > { %643 = vmatmul.mubr.msk.bf16.vlgmr.msra.gmra.mxu0 %vm319_vm1, %v295_v3 }
  0xd5   : > { %v357_v5 = vpop.f32.mrf.mxu0 }
  0xd6   : > { %v358_v6 = vadd.f32 %v613_v4, %v357_v5 }
  0xd7   : > { %v644_v7 = vpop.f32.mrf.mxu0 }
  0xd8   : > { %v363_v8 = vmul.f32 0.35355338, %v358_v6  ;;  %v633_v9 = vpack.c.bf16 %v358_v6, %v358_v6 }
  0xd9   : > { %v360_v10 = vpop.f32.mrf.mxu0 }
  0xda   : > { %v364_v11 = vpack.c.bf16 %v363_v8, %v363_v8  ;;  %387 = vrot.lane.b32.xlu1 %v633_v9, %s711_s11  ;;  %371 = vrot.lane.b32.xlu0 %v633_v9, %s712_s12 }
  0xdb   : > { %v645_v12 = vpop.f32.mrf.mxu0 }
  0xdc   : > { %366 = vst.msk [vmem:[%s788_s10] sm:$0xf] %vm365_vm2, %v364_v11 }
  0xde   : > { %407 = vrot.lane.b32.xlu1 %v633_v9, %s713_s13  ;;  %375 = vrot.lane.b32.xlu0 %v633_v9, %s714_s14 }
  0xe2   : > { %392 = vrot.lane.b32.xlu0 %v633_v9, %s715_s15  ;;  %382 = vrot.lane.b32.xlu1 %v364_v11, %s716_s16 }
  0xe6   : > { %402 = vrot.lane.b32.xlu0 %v633_v9, %s717_s17  ;;  %397 = vrot.lane.b32.xlu1 %v364_v11, %s718_s18 }
  0xea   : > { %412 = vrot.lane.b32.xlu0 %v364_v11, %s719_s22  ;;  %417 = vrot.lane.b32.xlu1 %v633_v9, %s720_s23 }
  0xee   : > { %422 = vrot.lane.b32.xlu0 %v633_v9, %s721_s24 }
 0x14c   : > { %v388_v13 = vpop.permute.xlu1 %387  ;;  %v372_v14 = vpop.permute.xlu0 %371 }
 0x14d   : > { %620 = vst.msk [vmem:[%s285_s27 + $0x4] sm:$0xf] %vm365_vm2, %v388_v13  ;;  %374 = vst.msk [vmem:[%s285_s27] sm:$0xf] %vm365_vm2, %v372_v14 }
 0x150   : > { %v408_v15 = vpop.permute.xlu1 %407  ;;  %v376_v16 = vpop.permute.xlu0 %375 }
 0x151   : > { %624 = vst.msk [vmem:[%s293_s30 + $0x8] sm:$0xf] %vm365_vm2, %v408_v15  ;;  %378 = vst.msk [vmem:[%s293_s30] sm:$0xf] %vm365_vm2, %v376_v16 }
 0x154   : > { %v393_v17 = vpop.permute.xlu0 %392  ;;  %v383_v18 = vpop.permute.xlu1 %382 }
 0x155   : > { %621 = vst.msk [vmem:[%s293_s30 + $0x4] sm:$0xf] %vm365_vm2, %v393_v17  ;;  %619 = vst.msk [vmem:[%s788_s10 + $0x4] sm:$0xf] %vm365_vm2, %v383_v18 }
 0x158   : > { %v403_v19 = vpop.permute.xlu0 %402  ;;  %v398_v20 = vpop.permute.xlu1 %397 }
 0x159   : > { %623 = vst.msk [vmem:[%s285_s27 + $0x8] sm:$0xf] %vm365_vm2, %v403_v19  ;;  %622 = vst.msk [vmem:[%s788_s10 + $0x8] sm:$0xf] %vm365_vm2, %v398_v20 }
 0x15c   : > { %v413_v21 = vpop.permute.xlu0 %412  ;;  %v418_v22 = vpop.permute.xlu1 %417 }
 0x15d   : > { %625 = vst.msk [vmem:[%s788_s10 + $0xc] sm:$0xf] %vm365_vm2, %v413_v21  ;;  %626 = vst.msk [vmem:[%s285_s27 + $0xc] sm:$0xf] %vm365_vm2, %v418_v22 }
 0x160   : > { %v423_v23 = vpop.permute.xlu0 %422 }
 0x161   : > { %627 = vst.msk [vmem:[%s293_s30 + $0xc] sm:$0xf] %vm365_vm2, %v423_v23 }
 0x162 PF: > { %s16_s20 = sadd.s32 1, %s707_s20   ;;  %s829_s18 = smov %s703_s19 }
 0x163   : > { %p13_p5 = scmp.ge.s32.totalorder %s16_s20, 4   ;;  %s830_s19 = smov %s832_s21 }
 0x165   :  { %15 = sbr.rel (!%p13_p5) target bundleno = 2 (0x2), region = 95 }

// kernel: self_attention_pallas.3
= control target key start
LH: loop header
LB: loop body
LE: loop exit
PB: predicated region body
PF: predicated region fallthrough
CT: control target
= control target key end

     0   :  { %10 = vsyncpa [#allocation6], 0  ;;  %s1848_s0 = inlined_call_operand.vmem [shape: bf16[2,4,8,8], index: 0, kind: input, shape index: {}]   ;;  %s1849_s1 = inlined_call_operand.vmem [shape: bf16[2,4,8,8], index: 1, kind: input, shape index: {}]   ;;  %s1850_s2 = inlined_call_operand.vmem [shape: bf16[2,4,8,8], index: 2, kind: input, shape index: {}]   ;;  %s1851_s3 = inlined_call_operand.vmem [shape: bf16[32,32], index: 3, kind: input, shape index: {}]   ;;  %s1852_s4 = inlined_call_operand.vmem [shape: f32[1,32], index: 4, kind: input, shape index: {}]   ;;  %s1853_s5 = inlined_call_operand.hbm [shape: f32[2,8,32], index: 5, kind: output, shape index: {}]  }
   0x1   :  { %12 = vsyncpa [#allocation6 + $0x1], 0  ;;  %s1552_s18 = smov 0   ;;  %s1554_s19 = smov 0  }
   0x2   :  { %s1556_s20 = smov 0   ;;  %s1558_s21 = smov 0  }
   0x3   :  { %s1560_s22 = smov 0   ;;  %s1562_s23 = smov 0  }
   0x4 LB: > { %s1226_s24 = sadd.s32 4294967295, %s1515_s23   ;;  %s1227_s25 = sadd.s32 4294967294, %s1515_s23   ;;  %s1515_s23 = sphi %s1562_s23, %s18_s23   ;;  %s1511_s22 = sphi %s1560_s22, %s1860_s22   ;;  %s1507_s21 = sphi %s1558_s21, %s1859_s21   ;;  %s1503_s20 = sphi %s1556_s20, %s1858_s20   ;;  %s1499_s19 = sphi %s1554_s19, %s1857_s19   ;;  %s1495_s18 = sphi %s1552_s18, %s1856_s18  }
   0x5   : > { %s37_s26 = sadd.s32 1, %s1511_s22  ;;  %s172_s27 = sadd.s32 1, %s1503_s20 }
   0x6   : > { %p39_p0 = scmp.ge.s32.totalorder %s37_s26, 2  ;;  %p182_p1 = scmp.ne.s32.totalorder %s1503_s20, %s1499_s19 }
   0x7   : > { %p183_p2 = scmp.eq.s32.totalorder %s1226_s24, 1  ;;  %p188_p3 = scmp.ne.s32.totalorder %s1499_s19, %s1495_s18 }
   0x8   : > { %s1862_s26 = smov (%p39_p0, %s37_s26), 0  ;;  %p189_p5 = scmp.eq.s32.totalorder %s1227_s25, 1 }
   0x9   : > { %p1592_p4 = por %p183_p2, %p182_p1  ;;  %s167_s29 = ssub.s32 %s1511_s22, %s1862_s26 }
   0xa   : > { %p1230_p6 = scmp.ge.s32.totalorder %s1515_s23, 1  ;;  %p170_p7 = scmp.eq.s32.totalorder %s167_s29, 0 }
   0xb   : > { %p1599_p8 = por %p189_p5, %p188_p3  ;;  %p246_p9 = scmp.lt.s32.totalorder %s1515_s23, 3 }
   0xc   : > { %s1605_s6 = scalar_select %p170_p7, %s1503_s20, %s172_s27  }
   0xd   : > { %p247_p10 = pnand %p1230_p6, %p246_p9 }
   0xe   : > { %p293_p11 = scmp.lt.s32.totalorder (!%p247_p10), %s1507_s21, 1  ;;  %s1252_s15 = sshll.u32 (!%p247_p10), %s1507_s21, 7 }
   0xf   : > { %250 = sbr.rel (%p247_p10) target bundleno = 1024 (0x400), region = 40  ;;  %s1802_s27 = scalar_lea.hbm (!%p247_p10), %s1853_s5, %s1252_s15 }
  0x14   : > { %vm331_vm0 = vcmask 64512   ;;  %v1517_v0 = vmov 0.0   ;;  %s294_s7 = scalar_select %p293_p11, %s1507_s21, 1  ;;  %vm1518_vm1 = vmmov 0   ;;  %vm322_vm2 = vcmask 7168  }
  0x15   : > { %1282 = vmatprep.subr.bf16.mxu0 %v1517_v0  ;;  %1288 = vmatprep.subr.bf16.mxu1 %v1517_v0  ;;  %332 = vst.msk [vmem:[#allocation4] sm:$0xff] %vm331_vm0, %v1517_v0  ;;  %333 = vst.msk [vmem:[#allocation4 + $0x8] sm:$0xff] %vm331_vm0, %v1517_v0  ;;  %v1519_v13 = vmov -1e+30   ;;  %v1520_v32 = vmov 0   ;;  %vm661_vm3 = vcmask 1043456  }
  0x16   : > { %334 = vst.msk [vmem:[#allocation4 + $0x10] sm:$0xff] %vm331_vm0, %v1517_v0  ;;  %335 = vst.msk [vmem:[#allocation4 + $0x18] sm:$0xff] %vm331_vm0, %v1517_v0  ;;  %1284 = vmatprep.mubr.msk.bf16.mxu0 %vm1518_vm1, %v1517_v0  ;;  %1290 = vmatprep.mubr.msk.bf16.mxu1 %vm1518_vm1, %v1517_v0  ;;  %s1623_s8 = sshll.u32 %s294_s7, 4  ;;  %vm1096_vm4 = vcmask 261120   ;;  %s1521_s7 = smov [#allocation5]  }
  0x17   : > { %s308_s11 = scalar_lea.vmem %s1849_s1, %s1623_s8  ;;  %s300_s14 = scalar_lea.vmem %s1848_s0, %s1623_s8  ;;  %323 = vst.msk [vmem:[#allocation2] sm:$0xff] %vm322_vm2, %v1519_v13  ;;  %324 = vst.msk [vmem:[#allocation2 + $0x8] sm:$0xff] %vm322_vm2, %v1519_v13  ;;  %1413 = vset.pattern.permute.xlu0 %v1520_v32  ;;  %1414 = vset.pattern.permute.xlu1 %v1520_v32 }
  0x18   : > { %v340_v1 = vld [vmem:[%s308_s11] sm:$0xf]  ;;  %v341_v2 = vld [vmem:[%s308_s11 + $0x4] sm:$0xf]  ;;  %v342_v5 = vld [vmem:[%s308_s11 + $0x8] sm:$0xf]  ;;  %s1714_s17 = scalar_lea.vmem %s1850_s2, %s1623_s8 }
  0x19   : > { %v353_v3 = vsel %vm331_vm0, %v340_v1, 0  ;;  %v399_v4 = vsel %vm331_vm0, %v341_v2, 0  ;;  %v343_v6 = vld [vmem:[%s308_s11 + $0xc] sm:$0xf]  ;;  %v336_v7 = vld [vmem:[%s300_s14] sm:$0xf] }
  0x1a   : > { %1283 = vmatpush3.bf16.xpose.msra.mxu0 %v353_v3  ;;  %1289 = vmatpush3.bf16.xpose.msra.mxu1 %v399_v4  ;;  %v337_v8 = vld [vmem:[%s300_s14 + $0x4] sm:$0xf]  ;;  %v445_v9 = vsel %vm331_vm0, %v342_v5, 0  ;;  %v491_v10 = vsel %vm331_vm0, %v343_v6, 0  ;;  %v338_v11 = vld [vmem:[%s300_s14 + $0x8] sm:$0xf] }
  0x1b   : > { %1294 = vmatprep.subr.bf16.mxu0 %v1517_v0  ;;  %1300 = vmatprep.subr.bf16.mxu1 %v1517_v0  ;;  %v339_v12 = vld [vmem:[%s300_s14 + $0xc] sm:$0xf]  ;;  %325 = vst.msk [vmem:[#allocation2 + $0x10] sm:$0xff] %vm322_vm2, %v1519_v13  ;;  %326 = vst.msk [vmem:[#allocation2 + $0x18] sm:$0xff] %vm322_vm2, %v1519_v13  ;;  %v344_v50 = vld [vmem:[%s1714_s17] sm:$0xf] }
  0x1c   : > { %327 = vst.msk [vmem:[#allocation3] sm:$0xff] %vm322_vm2, %v1517_v0  ;;  %328 = vst.msk [vmem:[#allocation3 + $0x8] sm:$0xff] %vm322_vm2, %v1517_v0  ;;  %v663_v52 = vsel %vm661_vm3, %v344_v50, 0  ;;  %v345_v53 = vld [vmem:[%s1714_s17 + $0x4] sm:$0xf]  ;;  %s290_s11 = sand.u32 1, %s1499_s19  }
  0x1d   : > { %329 = vst.msk [vmem:[#allocation3 + $0x10] sm:$0xff] %vm322_vm2, %v1517_v0  ;;  %330 = vst.msk [vmem:[#allocation3 + $0x18] sm:$0xff] %vm322_vm2, %v1517_v0  ;;  %v709_v54 = vsel %vm661_vm3, %v345_v53, 0  ;;  %v346_v4 = vld [vmem:[%s1714_s17 + $0x8] sm:$0xf]  ;;  %s1231_s12 = sshll.u32 %s290_s11, 3 }
  0x1e   : > { %v1675_v35 = vld [vmem:[#allocation2] sm:$0xff]  ;;  %v1680_v38 = vld [vmem:[#allocation2 + $0x8] sm:$0xff]  ;;  %s292_s16 = scalar_lea.vmem [#allocation5], %s1231_s12  ;;  %s1099_s21 = scalar_lea.sflag [#allocation6], %s290_s11 }
  0x1f   : > { %v897_v50 = vld [vmem:[%s1851_s3 + $0x4] sm:$0xf]  ;;  %s1443_s8 = sshll.u32 %s1521_s7, 4  ;;  %s1444_s8 = int_to_ptr.vmem [resolvable:$false] %s1443_s8 }
  0x20   : > { %s1445_s9 = scalar_lea.vmem %s1444_s8, 256 }
  0x21   : > { %1285 = vmatmul.mubr.msk.bf16.vlgmr.msra.gmra.mxu0 %vm331_vm0, %v336_v7  ;;  %1291 = vmatmul.mubr.msk.bf16.vlgmr.msra.gmra.mxu1 %vm331_vm0, %v337_v8  ;;  %v755_v8 = vsel %vm661_vm3, %v346_v4, 0 }
  0x22   : > { %1295 = vmatpush3.bf16.xpose.msra.mxu0 %v445_v9  ;;  %1301 = vmatpush3.bf16.xpose.msra.mxu1 %v491_v10  ;;  %v1690_v42 = vld [vmem:[#allocation2 + $0x10] sm:$0xff]  ;;  %v1700_v46 = vld [vmem:[#allocation2 + $0x18] sm:$0xff]  ;;  %v347_v9 = vld [vmem:[%s1714_s17 + $0xc] sm:$0xf]  ;;  %s1113_s17 = sshll.u32 %s292_s16, 4  ;;  %s1804_s17 = int_to_ptr.vmem [resolvable:$true] %s1113_s17 }
  0x23   : > { %1296 = vmatprep.mubr.msk.bf16.mxu0 %vm1518_vm1, %v1517_v0  ;;  %1302 = vmatprep.mubr.msk.bf16.mxu1 %vm1518_vm1, %v1517_v0  ;;  %v801_v13 = vsel %vm661_vm3, %v347_v9, 0  ;;  %s1439_s29 = scalar_lea.vmem %s1804_s17, 128  ;;  %p1446_p1 = scmp.lt.s32.totalorder %s1804_s17, %s1444_s8 }
  0x24   : > { %1306 = vmatprep.subr.bf16.mxu0 %v1517_v0  ;;  %1312 = vmatprep.subr.bf16.mxu1 %v1517_v0  ;;  %p1440_p12 = scmp.ne.s32.totalorder %s1804_s17, %s1439_s29  ;;  %p1447_p2 = scmp.lt.s32.totalorder %s1445_s9, %s1439_s29 }
  0x26   : > { %p1441_p13 = pnand %p1440_p12, %p1592_p4  ;;  %p1448_p3 = por %p1447_p2, %p1446_p1 }
  0x28   : > { %p1442_p0 = pneg %p1441_p13 }
  0x29   : > { %1297 = vmatmul.mubr.msk.bf16.vlgmr.msra.gmra.mxu0 %vm331_vm0, %v338_v11  ;;  %1303 = vmatmul.mubr.msk.bf16.vlgmr.msra.gmra.mxu1 %vm331_vm0, %v339_v12 }
  0x2a   : > { %1308 = vmatprep.mubr.msk.bf16.mxu0 %vm1518_vm1, %v1517_v0  ;;  %1314 = vmatprep.mubr.msk.bf16.mxu1 %vm1518_vm1, %v1517_v0  ;;  %p1449_p5 = pnand %p1448_p3, %p1442_p0 }
  0x2b   : > { %1307 = vmatpush3.bf16.msra.mxu0 %v663_v52  ;;  %1313 = vmatpush3.bf16.msra.mxu1 %v709_v54  ;;  %v902_v52 = vsel %vm661_vm3, %v897_v50, 0 }
  0x2c   : > { %1318 = vmatprep.subr.bf16.mxu0 %v1517_v0  ;;  %1324 = vmatprep.subr.bf16.mxu1 %v1517_v0 }
  0xe1   : > { %v1665_v14 = vpop.f32.mrf.mxu0  ;;  %v1667_v15 = vpop.f32.mrf.mxu1 }
  0xe2   : > { %v537_v16 = vsel %vm331_vm0, %v1665_v14, -inf  ;;  %v540_v19 = vsel %vm331_vm0, %v1667_v15, -inf }
  0xe3   : > { %v1292_v17 = vpop.f32.mrf.mxu1  ;;  %538 = vmax.xlane.f32.xlu0 %v537_v16  ;;  %v1286_v18 = vpop.f32.mrf.mxu0 }
  0xe5   : > { %v392_v20 = vpop.f32.mrf.mxu0  ;;  %v438_v21 = vpop.f32.mrf.mxu1 }
  0xe7   : > { %v1293_v22 = vpop.f32.mrf.mxu1  ;;  %541 = vmax.xlane.f32.xlu0 %v540_v19  ;;  %v1287_v23 = vpop.f32.mrf.mxu0 }
  0xe9   : > { %v481_v24 = vpop.f32.mrf.mxu0  ;;  %v527_v25 = vpop.f32.mrf.mxu1 }
  0xea   : > { %v543_v26 = vsel %vm331_vm0, %v481_v24, -inf  ;;  %v546_v29 = vsel %vm331_vm0, %v527_v25, -inf }
  0xeb   : > { %v1304_v27 = vpop.f32.mrf.mxu1  ;;  %544 = vmax.xlane.f32.xlu1 %v543_v26  ;;  %v1298_v28 = vpop.f32.mrf.mxu0 }
  0xec   : > { %v597_v28 = vld [vmem:[#allocation3] sm:$0xff] }
  0xed   : > { %v484_v30 = vpop.f32.mrf.mxu0  ;;  %v530_v31 = vpop.f32.mrf.mxu1 }
  0xee   : > { %v598_v31 = vld [vmem:[#allocation3 + $0x8] sm:$0xff] }
  0xef   : > { %v1305_v33 = vpop.f32.mrf.mxu1  ;;  %547 = vmax.xlane.f32.xlu1 %v546_v29  ;;  %v1299_v34 = vpop.f32.mrf.mxu0 }
 0x16c   : > { %v539_v36 = vpop.xlane.xlu0 %538 }
 0x16d   : > { %v1678_v37 = vmax.f32 %v1675_v35, %v539_v36 }
 0x16f   : > { %v553_v39 = vsub.f32 %v1675_v35, %v1678_v37  ;;  %851 = vst.msk [vmem:[#allocation2] sm:$0xff] %vm322_vm2, %v1678_v37  ;;  %567 = vperm.xlu0 %1413, %v1678_v37   ;;  %v599_v35 = vld [vmem:[#allocation3 + $0x10] sm:$0xff] }
 0x170   : > { %v542_v40 = vpop.xlane.xlu0 %541 }
 0x171   : > { %v1688_v41 = vmax.f32 %v1680_v38, %v542_v40 }
 0x173   : > { %v554_v43 = vsub.f32 %v1680_v38, %v1688_v41  ;;  %852 = vst.msk [vmem:[#allocation2 + $0x8] sm:$0xff] %vm322_vm2, %v1688_v41  ;;  %572 = vperm.xlu1 %1414, %v1688_v41  }
 0x174   : > { %v545_v44 = vpop.xlane.xlu1 %544 }
 0x175   : > { %v1698_v45 = vmax.f32 %v1690_v42, %v545_v44  ;;  %v559_v19 = vmul.f32 1.442695, %v554_v43 }
 0x177   : > { %v555_v47 = vsub.f32 %v1690_v42, %v1698_v45  ;;  %853 = vst.msk [vmem:[#allocation2 + $0x10] sm:$0xff] %vm322_vm2, %v1698_v45  ;;  %577 = vperm.xlu1 %1414, %v1698_v45  }
 0x178   : > { %v548_v48 = vpop.xlane.xlu1 %547 }
 0x179   : > { %v1708_v49 = vmax.f32 %v1700_v46, %v548_v48  ;;  %v561_v22 = vmul.f32 1.442695, %v555_v47  ;;  %v895_v47 = vld [vmem:[%s1851_s3] sm:$0xf] }
 0x17a   : > { %v948_v48 = vsel %vm661_vm3, %v895_v47, 0 }
 0x17b   : > { %v556_v51 = vsub.f32 %v1700_v46, %v1708_v49  ;;  %854 = vst.msk [vmem:[#allocation2 + $0x18] sm:$0xff] %vm322_vm2, %v1708_v49  ;;  %582 = vperm.xlu1 %1414, %v1708_v49  }
 0x17d   : > { %v563_v23 = vmul.f32 1.442695, %v556_v51 }
 0x1ea   : > { %v568_v55 = vpop.permute.xlu0 %567 }
 0x1eb   : > { %v585_v56 = vsub.f32 %v1665_v14, %v568_v55  ;;  %v557_v14 = vmul.f32 1.442695, %v553_v39  ;;  %v600_v39 = vld [vmem:[#allocation3 + $0x18] sm:$0xff] }
 0x1ed   : > { %v589_v57 = vmul.f32 1.442695, %v585_v56 }
 0x1ee   : > { %v573_v58 = vpop.permute.xlu1 %572 }
 0x1ef   : > { %1415 = vpow2.f32 %v589_v57  ;;  %v586_v59 = vsub.f32 %v1667_v15, %v573_v58  ;;  %v626_v57 = vld [vmem:[#allocation4] sm:$0xff] }
 0x1f1   : > { %v591_v60 = vmul.f32 1.442695, %v586_v59 }
 0x1f2   : > { %v578_v61 = vpop.permute.xlu1 %577 }
 0x1f3   : > { %1417 = vpow2.f32 %v591_v60  ;;  %v587_v62 = vsub.f32 %v481_v24, %v578_v61  ;;  %v627_v60 = vld [vmem:[#allocation4 + $0x8] sm:$0xff] }
 0x1f5   : > { %v593_v63 = vmul.f32 1.442695, %v587_v62 }
 0x1f6   : > { %v583_v1 = vpop.permute.xlu1 %582 }
 0x1f7   : > { %1419 = vpow2.f32 %v593_v63  ;;  %v588_v2 = vsub.f32 %v527_v25, %v583_v1 }
 0x1f9   : > { %v595_v3 = vmul.f32 1.442695, %v588_v2 }
 0x1fb   : > { %1421 = vpow2.f32 %v595_v3  ;;  %v628_v3 = vld [vmem:[#allocation4 + $0x10] sm:$0xff] }
 0x1fc   : > { %v1416_v5 = vpop.eup %1415  ;;  %1423 = vpow2.f32 %v557_v14 }
 0x1fd   : > { %v605_v6 = vsel %vm331_vm0, %v1416_v5, 0.0  ;;  %v654_v7 = vpack.c.bf16 %v1416_v5, %v1416_v5  ;;  %1425 = vpow2.f32 %v559_v19 }
 0x1fe   : > { %606 = vadd.xlane.f32.xlu0 %v605_v6  ;;  %1427 = vpow2.f32 %v561_v22 }
 0x1ff   : > { %1309 = vmatmul.mubr.msk.bf16.vlgmr.msra.gmra.mxu0 %vm331_vm0, %v654_v7  ;;  %1429 = vpow2.f32 %v563_v23 }
 0x200   : > { %v1418_v10 = vpop.eup %1417  ;;  %1319 = vmatpush3.bf16.msra.mxu0 %v755_v8  ;;  %1320 = vmatprep.mubr.msk.bf16.mxu0 %vm1518_vm1, %v1517_v0 }
 0x201   : > { %v608_v11 = vsel %vm331_vm0, %v1418_v10, 0.0  ;;  %v655_v12 = vpack.c.bf16 %v1418_v10, %v1418_v10  ;;  %1330 = vmatprep.subr.bf16.mxu0 %v1517_v0 }
 0x202   : > { %609 = vadd.xlane.f32.xlu1 %v608_v11  ;;  %v629_v11 = vld [vmem:[#allocation4 + $0x18] sm:$0xff] }
 0x203   : > { %1315 = vmatmul.mubr.msk.bf16.vlgmr.msra.gmra.mxu1 %vm331_vm0, %v655_v12 }
 0x204   : > { %v1420_v15 = vpop.eup %1419  ;;  %1325 = vmatpush3.bf16.msra.mxu1 %v801_v13  ;;  %1326 = vmatprep.mubr.msk.bf16.mxu1 %vm1518_vm1, %v1517_v0 }
 0x205   : > { %v611_v16 = vsel %vm331_vm0, %v1420_v15, 0.0  ;;  %v656_v17 = vpack.c.bf16 %v1420_v15, %v1420_v15  ;;  %1336 = vmatprep.subr.bf16.mxu1 %v1517_v0 }
 0x206   : > { %612 = vadd.xlane.f32.xlu1 %v611_v16 }
 0x207   : > { %1321 = vmatmul.mubr.msk.bf16.vlgmr.msra.gmra.mxu0 %vm331_vm0, %v656_v17 }
 0x208   : > { %v1422_v18 = vpop.eup %1421  ;;  %1332 = vmatprep.mubr.msk.bf16.mxu0 %vm1518_vm1, %v1517_v0  ;;  %1331 = vmatpush3.bf16.msra.mxu0 %v902_v52 }
 0x209   : > { %v614_v20 = vsel %vm331_vm0, %v1422_v18, 0.0  ;;  %v657_v21 = vpack.c.bf16 %v1422_v18, %v1422_v18  ;;  %v1424_v24 = vpop.eup %1423  ;;  %1342 = vmatprep.subr.bf16.mxu0 %v1517_v0 }
 0x20a   : > { %615 = vadd.xlane.f32.xlu1 %v614_v20  ;;  %v1426_v25 = vpop.eup %1425  ;;  %v601_v29 = vmul.f32 %v1424_v24, %v597_v28 }
 0x20b   : > { %1327 = vmatmul.mubr.msk.bf16.vlgmr.msra.gmra.mxu1 %vm331_vm0, %v657_v21  ;;  %v1428_v26 = vpop.eup %1427  ;;  %v602_v33 = vmul.f32 %v1426_v25, %v598_v31 }
 0x20c   : > { %1338 = vmatprep.mubr.msk.bf16.mxu1 %vm1518_vm1, %v1517_v0  ;;  %v1430_v27 = vpop.eup %1429  ;;  %v603_v37 = vmul.f32 %v1428_v26, %v599_v35  ;;  %1337 = vmatpush3.bf16.msra.mxu1 %v948_v48 }
 0x20d   : > { %v604_v42 = vmul.f32 %v1430_v27, %v600_v39  ;;  %1348 = vmatprep.subr.bf16.mxu1 %v1517_v0 }
 0x214   : > { %632 = vperm.xlu0 %1413, %v1424_v24  }
 0x21b   : > { %637 = vperm.xlu1 %1414, %v1426_v25  }
 0x21f   : > { %642 = vperm.xlu1 %1414, %v1428_v26  }
 0x223   : > { %647 = vperm.xlu1 %1414, %v1430_v27   ;;  %v1040_v27 = vld [vmem:[%s1851_s3 + $0xc] sm:$0xf] }
 0x287   : > { %v607_v30 = vpop.xlane.xlu0 %606 }
 0x288   : > { %v617_v32 = vadd.f32 %v607_v30, %v601_v29  ;;  %v1045_v30 = vsel %vm661_vm3, %v1040_v27, 0 }
 0x28a   : > { %622 = vst.msk [vmem:[#allocation3] sm:$0xff] %vm322_vm2, %v617_v32 }
 0x28b   : > { %v610_v34 = vpop.xlane.xlu1 %609 }
 0x28c   : > { %v618_v36 = vadd.f32 %v610_v34, %v602_v33  ;;  %v991_v33 = vld [vmem:[%s1851_s3 + $0x8] sm:$0xf] }
 0x28e   : > { %623 = vst.msk [vmem:[#allocation3 + $0x8] sm:$0xff] %vm322_vm2, %v618_v36  ;;  %v996_v36 = vsel %vm661_vm3, %v991_v33, 0 }
 0x28f   : > { %v613_v38 = vpop.xlane.xlu1 %612  ;;  %v633_v58 = vpop.permute.xlu0 %632 }
 0x290   : > { %v619_v40 = vadd.f32 %v613_v38, %v603_v37  ;;  %v650_v59 = vmul.f32 %v633_v58, %v626_v57 }
 0x291   : > { %v858_v41 = vld [vmem:[#allocation3] sm:$0xff] }
 0x292   : > { %624 = vst.msk [vmem:[#allocation3 + $0x10] sm:$0xff] %vm322_vm2, %v619_v40  ;;  %1431 = vrcp.f32 %v858_v41 }
 0x293   : > { %v616_v43 = vpop.xlane.xlu1 %615 }
 0x294   : > { %v620_v44 = vadd.f32 %v616_v43, %v604_v42 }
 0x295   : > { %v859_v45 = vld [vmem:[#allocation3 + $0x8] sm:$0xff] }
 0x296   : > { %625 = vst.msk [vmem:[#allocation3 + $0x18] sm:$0xff] %vm322_vm2, %v620_v44  ;;  %1433 = vrcp.f32 %v859_v45 }
 0x297   : > { %v638_v56 = vpop.permute.xlu1 %637 }
 0x298   : > { %v651_v2 = vmul.f32 %v638_v56, %v627_v60  ;;  %v1250_v56 = vld [vmem:[%s1852_s4] ss:$0 sm:$0xff] }
 0x299   : > { %v860_v46 = vld [vmem:[#allocation3 + $0x10] sm:$0xff] }
 0x29a   : > { %1435 = vrcp.f32 %v860_v46 }
 0x29b   : > { %v643_v62 = vpop.permute.xlu1 %642 }
 0x29c   : > { %v652_v9 = vmul.f32 %v643_v62, %v628_v3 }
 0x29d   : > { %v861_v49 = vld [vmem:[#allocation3 + $0x18] sm:$0xff] }
 0x29e   : > { %1437 = vrcp.f32 %v861_v49 }
 0x29f   : > { %v1432_v51 = vpop.eup %1431  ;;  %v648_v10 = vpop.permute.xlu1 %647 }
 0x2a0   : > { %872 = vperm.xlu0 %1413, %v1432_v51   ;;  %v653_v17 = vmul.f32 %v648_v10, %v629_v11 }
 0x2a3   : > { %v1434_v53 = vpop.eup %1433 }
 0x2a4   : > { %877 = vperm.xlu1 %1414, %v1434_v53  }
 0x2a7   : > { %v1436_v54 = vpop.eup %1435 }
 0x2a8   : > { %882 = vperm.xlu1 %1414, %v1436_v54  }
 0x2ab   : > { %v1438_v55 = vpop.eup %1437 }
 0x2ac   : > { %887 = vperm.xlu0 %1413, %v1438_v55  }
 0x2bf   : > { %v699_v61 = vpop.f32.mrf.mxu0 }
 0x2c0   : > { %v843_v63 = vadd.f32 %v699_v61, %v650_v59 }
 0x2c1   : > { %v1310_v1 = vpop.f32.mrf.mxu0 }
 0x2c2   : > { %847 = vst.msk [vmem:[#allocation4] sm:$0xff] %vm331_vm0, %v843_v63 }
 0x2c3   : > { %v702_v4 = vpop.f32.mrf.mxu0  ;;  %v745_v5 = vpop.f32.mrf.mxu1 }
 0x2c4   : > { %v844_v6 = vadd.f32 %v745_v5, %v651_v2 }
 0x2c5   : > { %v1311_v7 = vpop.f32.mrf.mxu0  ;;  %v1316_v8 = vpop.f32.mrf.mxu1 }
 0x2c6   : > { %848 = vst.msk [vmem:[#allocation4 + $0x8] sm:$0xff] %vm331_vm0, %v844_v6 }
 0x2c7   : > { %v748_v12 = vpop.f32.mrf.mxu1  ;;  %v791_v13 = vpop.f32.mrf.mxu0 }
 0x2c8   : > { %v845_v14 = vadd.f32 %v791_v13, %v652_v9 }
 0x2c9   : > { %v1317_v15 = vpop.f32.mrf.mxu1  ;;  %v1322_v16 = vpop.f32.mrf.mxu0  ;;  %v866_v26 = vld [vmem:[#allocation4] sm:$0xff] }
 0x2ca   : > { %849 = vst.msk [vmem:[#allocation4 + $0x10] sm:$0xff] %vm331_vm0, %v845_v14 }
 0x2cb   : > { %v794_v18 = vpop.f32.mrf.mxu0  ;;  %v837_v19 = vpop.f32.mrf.mxu1 }
 0x2cc   : > { %v846_v20 = vadd.f32 %v837_v19, %v653_v17 }
 0x2cd   : > { %v1323_v21 = vpop.f32.mrf.mxu0  ;;  %v1328_v22 = vpop.f32.mrf.mxu1  ;;  %v867_v31 = vld [vmem:[#allocation4 + $0x8] sm:$0xff] }
 0x2ce   : > { %850 = vst.msk [vmem:[#allocation4 + $0x18] sm:$0xff] %vm331_vm0, %v846_v20 }
 0x2cf   : > { %v840_v23 = vpop.f32.mrf.mxu1 }
 0x2d1   : > { %v1329_v24 = vpop.f32.mrf.mxu1  ;;  %v868_v38 = vld [vmem:[#allocation4 + $0x10] sm:$0xff] }
 0x2d5   : > { %v869_v41 = vld [vmem:[#allocation4 + $0x18] sm:$0xff] }
 0x31b   : > { %v873_v25 = vpop.permute.xlu0 %872 }
 0x31c   : > { %v890_v28 = vmul.f32 %v873_v25, %v866_v26 }
 0x31e   : > { %v894_v29 = vpack.c.bf16 %v890_v28, %v890_v28 }
 0x31f   : > { %v878_v32 = vpop.permute.xlu1 %877 }
 0x320   : > { %v891_v34 = vmul.f32 %v878_v32, %v867_v31  ;;  %1339 = vmatmul.mubr.msk.bf16.vlgmr.msra.gmra.mxu1 %vm331_vm0, %v894_v29 }
 0x321   : > { %1349 = vmatpush3.bf16.msra.mxu1 %v1045_v30  ;;  %1350 = vmatprep.mubr.msk.bf16.mxu1 %vm1518_vm1, %v1517_v0 }
 0x322   : > { %v896_v35 = vpack.c.bf16 %v891_v34, %v891_v34 }
 0x323   : > { %v883_v37 = vpop.permute.xlu1 %882 }
 0x324   : > { %1333 = vmatmul.mubr.msk.bf16.vlgmr.msra.gmra.mxu0 %vm331_vm0, %v896_v35  ;;  %v892_v39 = vmul.f32 %v883_v37, %v868_v38 }
 0x325   : > { %1343 = vmatpush3.bf16.msra.mxu0 %v996_v36  ;;  %1344 = vmatprep.mubr.msk.bf16.mxu0 %vm1518_vm1, %v1517_v0 }
 0x326   : > { %v990_v43 = vpack.c.bf16 %v892_v39, %v892_v39 }
 0x327   : > { %v888_v40 = vpop.permute.xlu0 %887 }
 0x328   : > { %v893_v42 = vmul.f32 %v888_v40, %v869_v41 }
 0x32a   : > { %v1039_v44 = vpack.c.bf16 %v893_v42, %v893_v42 }
 0x32c   : > { %1345 = vmatmul.mubr.msk.bf16.vlgmr.msra.gmra.mxu0 %vm331_vm0, %v990_v43  ;;  %1351 = vmatmul.mubr.msk.bf16.vlgmr.msra.gmra.mxu1 %vm331_vm0, %v1039_v44 }
 0x3e0   : > { %v984_v45 = vpop.f32.mrf.mxu1 }
 0x3e2   : > { %v1340_v46 = vpop.f32.mrf.mxu1 }
 0x3e4   : > { %v938_v47 = vpop.f32.mrf.mxu0  ;;  %v987_v48 = vpop.f32.mrf.mxu1 }
 0x3e5   : > { %v985_v52 = vadd.f32 %v984_v45, %v938_v47 }
 0x3e6   : > { %v1334_v49 = vpop.f32.mrf.mxu0  ;;  %v1341_v50 = vpop.f32.mrf.mxu1 }
 0x3e8   : > { %v941_v51 = vpop.f32.mrf.mxu0 }
 0x3ea   : > { %v1335_v0 = vpop.f32.mrf.mxu0 }
 0x3ec   : > { %v1032_v53 = vpop.f32.mrf.mxu0  ;;  %v1081_v54 = vpop.f32.mrf.mxu1 }
 0x3ed   : > { %v1038_v55 = vadd.f32 %v1032_v53, %v985_v52 }
 0x3ee   : > { %v1346_v57 = vpop.f32.mrf.mxu0  ;;  %v1352_v58 = vpop.f32.mrf.mxu1 }
 0x3ef   : > { %v1087_v59 = vadd.f32 %v1081_v54, %v1038_v55 }
 0x3f0   : > { %v1035_v60 = vpop.f32.mrf.mxu0  ;;  %v1084_v61 = vpop.f32.mrf.mxu1 }
 0x3f1   : > { %v1095_v62 = vadd.f32 %v1250_v56, %v1087_v59 }
 0x3f2   : > { %v1347_v63 = vpop.f32.mrf.mxu0  ;;  %v1353_v1 = vpop.f32.mrf.mxu1 }
 0x3f3   : > { %1097 = vst.msk [vmem:[%s292_s16] sm:$0xff] %vm1096_vm4, %v1095_v62 }
 0x3f4   : > { %1452 = shalt.err (!%p1449_p5)
}
 0x3f5   : > { %s1453_s10 = scalar_lea.hbm %s1802_s27, 128  ;;  %s1457_s13 = scalar_lea.hbm %s1853_s5, 256 }
 0x3f6   : > { %p1454_p6 = scmp.ne.s32.totalorder %s1802_s27, %s1453_s10  ;;  %p1458_p10 = scmp.lt.s32.totalorder %s1802_s27, %s1853_s5 }
 0x3f7   : > { %p1459_p11 = scmp.lt.s32.totalorder %s1457_s13, %s1453_s10 }
 0x3f8   : > { %p1455_p7 = pnand %p1454_p6, %p1592_p4 }
 0x3f9   : > { %p1460_p12 = por %p1459_p11, %p1458_p10 }
 0x3fa   : > { %p1456_p9 = pneg %p1455_p7 }
 0x3fc   : > { %p1461_p13 = pnand %p1460_p12, %p1456_p9 }
 0x3fe   : > { %1464 = shalt.err (!%p1461_p13)
}
 0x3ff   : > { %1354 = dma.vmem_to_hbm [thread:$0]  (%p1592_p4), %s1804_s17, 128, %s1802_s27, %s1099_s21  }
 0x400 PF: > { %p1360_p0 = scmp.ge.s32.totalorder %s1515_s23, 2  ;;  %s1125_s16 = sand.u32 1, %s1495_s18  }
 0x401   : > { %s1126_s24 = scalar_lea.sflag [#allocation6], %s1125_s16 }
 0x402   : > { %p1357_p1 = pnand %p1360_p0, %p1599_p8 }
 0x404   : > { %p1358_p2 = pneg %p1357_p1 }
 0x406   : > { %1490 = dma.done.wait (%p1358_p2), %s1126_s24, 128  }
 0x407   : > { %1492 = vsyncadd (%p1358_p2), %s1126_s24, 4294967168  ;;  %s18_s23 = sadd.s32 1, %s1515_s23   ;;  %s1856_s18 = smov %s1499_s19 }
 0x408   : > { %p15_p3 = scmp.ge.s32.totalorder %s18_s23, 4   ;;  %s1857_s19 = smov %s1503_s20 }
 0x409   : > { %s1858_s20 = smov %s1605_s6  ;;  %s1859_s21 = smov %s1511_s22 }
 0x40a   : > { %s1860_s22 = smov %s1862_s26  ;;  %17 = sbr.rel (!%p15_p3) target bundleno = 4 (0x4), region = 89 }
 0x40f   :  { %1131 = vsyncpa [#allocation6], 1 }
 0x410   :  { %1133 = vsyncpa [#allocation6 + $0x1], 1 }

</bundles_post_ra>
